<compile_context>
chip_gen: v5e
topology: v5e:2x2
jax: 0.10.0
libtpu: 0.0.40
codegen_flags: <defaults>
</compile_context>

<pallas_src>
import math
import functools

import jax
import jax.numpy as jnp
from jax.experimental import pallas as pl
from jax.experimental.pallas import tpu as pltpu

# ----------------------------- config ------------------------------------- #
B = 2          # batch
S = 8          # sequence length
D = 32         # d_model
HEADS = 4      # heads
N_LAYERS = 2   # N
EPS = 1e-6
NEG_INF = -1000000000.0


# --------------------------- kernel helpers -------------------------------- #
def _layer_norm(x, alpha, bias):
    # torch Norm: alpha * (x - mean) / (std_unbiased + eps) + bias   (ddof=1)
    mean = jnp.mean(x, axis=-1, keepdims=True)
    cen = x - mean
    var = jnp.sum(cen * cen, axis=-1, keepdims=True) / (x.shape[-1] - 1)
    std = jnp.sqrt(var)
    inv = pl.reciprocal(std + EPS, approx=False)   # exact; keeps 1e-4 tolerance
    return alpha * (cen * inv) + bias


def _softmax_last(x):
    m = jnp.max(x, axis=-1, keepdims=True)
    e = jnp.exp(x - m)
    denom = jnp.sum(e, axis=-1, keepdims=True)
    return e * pl.reciprocal(denom, approx=False)


# ------------------------------ the kernel --------------------------------- #
def eventer_kernel(x_ref, mask_ref,
                   na_ref, nb_ref,
                   wq_ref, bq_ref, wkv_ref, bkv_ref,
                   wo_ref, bo_ref,
                   fa_ref, fb_ref,
                   o_ref,
                   *, n_layers, heads):
    bb, seq, d_model = x_ref.shape           # batch-block, S, D
    d_k = d_model // heads
    inv_sqrt_dk = 1.0 / math.sqrt(d_k)

    # Stack batch*seq along sublanes: all projection matmuls run on
    # (bb*S, D) rows, doubling row occupancy when the batch is collapsed.
    x = x_ref[...].astype(jnp.float32).reshape(bb * seq, d_model)

    # Hoist the mask compare+select out of the unrolled layer/head loops:
    # one compare total, cheap adds inside the loops.
    add_mask = jnp.where(mask_ref[...] == 0, NEG_INF, 0.0).astype(jnp.float32)  # (bb,S,S)

    for i in range(n_layers):                 # static unroll over layers
        # pre-norm (norm_1); q from normed x2, k/v from raw residual stream x
        x2 = _layer_norm(x, na_ref[i], nb_ref[i])

        q = jnp.dot(x2, wq_ref[i], preferred_element_type=jnp.float32) + bq_ref[i]
        # fused K/V projection: one (bb*S, D) @ (D, 2D) matmul
        kv = jnp.dot(x, wkv_ref[i], preferred_element_type=jnp.float32) + bkv_ref[i]
        k = kv[:, :d_model]
        v = kv[:, d_model:]

        # multi-head attention; per-batch, per-head static slices
        outs = []
        for b in range(bb):
            rows = slice(b * seq, (b + 1) * seq)
            qb, vb = q[rows], v[rows]
            kbT = k[rows].T                   # one transpose per (layer, batch)
            mb = add_mask[b]
            head_outs = []
            for h in range(heads):
                sl = slice(h * d_k, (h + 1) * d_k)
                scores = jnp.dot(qb[:, sl], kbT[sl, :],
                                 preferred_element_type=jnp.float32) * inv_sqrt_dk
                probs = _softmax_last(scores + mb)
                head_outs.append(jnp.dot(probs, vb[:, sl],
                                         preferred_element_type=jnp.float32))
            outs.append(jnp.concatenate(head_outs, axis=-1))   # (S, D)

        concat = outs[0] if bb == 1 else jnp.concatenate(outs, axis=0)  # (bb*S, D)
        # single fused output projection + bias added once
        attn_out = jnp.dot(concat, wo_ref[i],
                           preferred_element_type=jnp.float32) + bo_ref[i]

        # dropout_1 / attention dropout are identity in eval mode
        x = x + attn_out

    # final Norm
    out = _layer_norm(x, fa_ref[0], fb_ref[0])
    o_ref[...] = out.reshape(bb, seq, d_model).astype(o_ref.dtype)


# --------------------------- device heuristics ------------------------------ #
def _tensorcores_per_chip():
    try:
        kind = jax.devices()[0].device_kind.lower()
    except Exception:
        return 1
    # v7x exposes 2 TensorCores per chip; v5e / v6e are single-TC.
    if "v7" in kind or "7x" in kind:
        return 2
    return 1


# ------------------------------ wrapper ------------------------------------ #
def eventer_forward(x, mask, params, *, heads=HEADS, batch_block=None):
    Bx, Sx, Dx = x.shape
    N = params["na"].shape[0]

    # Pre-fuse K and V projection weights/biases in the wrapper (free).
    wkv = jnp.concatenate([params["wk"], params["wv"]], axis=-1)   # (N, D, 2D)
    bkv = jnp.concatenate([params["bk"], params["bv"]], axis=-1)   # (N, 2D)

    if batch_block is None:
        # Single-TC parts (v5e/v6e): collapse batch into one grid step.
        # v7x: keep grid=(B,) so batches shard across the 2 TensorCores.
        batch_block = Bx if _tensorcores_per_chip() == 1 else 1
    batch_block = max(1, min(batch_block, Bx))
    if Bx % batch_block != 0:
        batch_block = 1
    n_blocks = Bx // batch_block

    kernel = functools.partial(eventer_kernel, n_layers=N, heads=heads)

    full2 = lambda b: (0, 0)
    full3 = lambda b: (0, 0, 0)

    return pl.pallas_call(
        kernel,
        out_shape=jax.ShapeDtypeStruct((Bx, Sx, Dx), x.dtype),
        grid=(n_blocks,),
        in_specs=[
            pl.BlockSpec((batch_block, Sx, Dx), lambda b: (b, 0, 0)),  # x
            pl.BlockSpec((batch_block, Sx, Sx), lambda b: (b, 0, 0)),  # mask
            pl.BlockSpec((N, Dx), full2),                              # norm1 alpha
            pl.BlockSpec((N, Dx), full2),                              # norm1 bias
            pl.BlockSpec((N, Dx, Dx), full3),                          # Wq (in,out)
            pl.BlockSpec((N, Dx), full2),                              # bq
            pl.BlockSpec((N, Dx, 2 * Dx), full3),                      # Wkv fused
            pl.BlockSpec((N, 2 * Dx), full2),                          # bkv fused
            pl.BlockSpec((N, Dx, Dx), full3),                          # Wo
            pl.BlockSpec((N, Dx), full2),                              # bo
            pl.BlockSpec((1, Dx), full2),                              # final alpha
            pl.BlockSpec((1, Dx), full2),                              # final bias
        ],
        out_specs=pl.BlockSpec((batch_block, Sx, Dx), lambda b: (b, 0, 0)),
        compiler_params=pltpu.CompilerParams(
            dimension_semantics=("parallel",)),
    )(x, mask,
      params["na"], params["nb"],
      params["wq"], params["bq"], wkv, bkv,
      params["wo"], params["bo"],
      params["fa"], params["fb"])


# --------------------------- pure-JAX reference ----------------------------- #
def ref_forward(x, mask, p):
    def ln(x, a, b):
        m = x.mean(-1, keepdims=True)
        c = x - m
        std = jnp.sqrt((c * c).sum(-1, keepdims=True) / (x.shape[-1] - 1))
        return a * c / (std + EPS) + b

    Bx, Sx, Dx = x.shape
    dk = Dx // HEADS
    N = p["na"].shape[0]
    for i in range(N):
        x2 = ln(x, p["na"][i], p["nb"][i])
        q = x2 @ p["wq"][i] + p["bq"][i]
        k = x @ p["wk"][i] + p["bk"][i]
        v = x @ p["wv"][i] + p["bv"][i]
        qh = q.reshape(Bx, Sx, HEADS, dk).transpose(0, 2, 1, 3)
        kh = k.reshape(Bx, Sx, HEADS, dk).transpose(0, 2, 1, 3)
        vh = v.reshape(Bx, Sx, HEADS, dk).transpose(0, 2, 1, 3)
        sc = qh @ kh.transpose(0, 1, 3, 2) / math.sqrt(dk)
        sc = jnp.where(mask[:, None] == 0, NEG_INF, sc)
        sc = jax.nn.softmax(sc, axis=-1)
        o = (sc @ vh).transpose(0, 2, 1, 3).reshape(Bx, Sx, Dx)
        x = x + o @ p["wo"][i] + p["bo"][i]
    return ln(x, p["fa"][0], p["fb"][0])


# ------------------------------- main --------------------------------------- #
if __name__ == "__main__":
    key = jax.random.PRNGKey(0)
    ks = jax.random.split(key, 12)

    # Deterministic synthetic parameters.  `get_clones` deep-copies one layer,
    # so per-layer weights being equal or distinct is equivalent semantically;
    # we generate distinct ones for generality.  Norm params match torch init
    # (alpha=1, bias=0).  Linear weights are stored pre-transposed as
    # (D_in, D_out) so that y = x @ W + b matches torch's x @ W_torch.T + b.
    def w(k):  # (N, D_in, D_out)
        return (0.1 * jax.random.normal(k, (N_LAYERS, D, D))).astype(jnp.float32)

    def bvec(k):
        return (0.05 * jax.random.normal(k, (N_LAYERS, D))).astype(jnp.float32)

    params = dict(
        na=jnp.ones((N_LAYERS, D), jnp.float32),
        nb=jnp.zeros((N_LAYERS, D), jnp.float32),
        wq=w(ks[0]), bq=bvec(ks[1]),
        wk=w(ks[2]), bk=bvec(ks[3]),
        wv=w(ks[4]), bv=bvec(ks[5]),
        wo=w(ks[6]), bo=bvec(ks[7]),
        fa=jnp.ones((1, D), jnp.float32),
        fb=jnp.zeros((1, D), jnp.float32),
    )

    x = jax.random.normal(ks[8], (B, S, D), dtype=jnp.float32)
    # causal mask (1 = keep, 0 = masked), shape (B, S, S)
    mask = jnp.broadcast_to(jnp.tril(jnp.ones((S, S), jnp.float32)), (B, S, S))

    out = eventer_forward(x, mask, params)
    out = jax.block_until_ready(out)

    ref = ref_forward(x, mask, params)
    assert out.shape == (B, S, D)
    assert jnp.allclose(out, ref, rtol=1e-4, atol=1e-4), float(jnp.abs(out - ref).max())

    print("KERNEL_OK")
</pallas_src>

<mosaic_0001>
module attributes {stable_mosaic.version = 11 : i64} {
  func.func @eventer_kernel(%arg0: i32, %arg1: memref<2x8x32xf32, #tpu.memory_space<vmem>>, %arg2: memref<2x8x8xf32, #tpu.memory_space<vmem>>, %arg3: memref<2x32xf32, #tpu.memory_space<vmem>>, %arg4: memref<2x32xf32, #tpu.memory_space<vmem>>, %arg5: memref<2x32x32xf32, #tpu.memory_space<vmem>>, %arg6: memref<2x32xf32, #tpu.memory_space<vmem>>, %arg7: memref<2x32x64xf32, #tpu.memory_space<vmem>>, %arg8: memref<2x64xf32, #tpu.memory_space<vmem>>, %arg9: memref<2x32x32xf32, #tpu.memory_space<vmem>>, %arg10: memref<2x32xf32, #tpu.memory_space<vmem>>, %arg11: memref<1x32xf32, #tpu.memory_space<vmem>>, %arg12: memref<1x32xf32, #tpu.memory_space<vmem>>, %arg13: memref<2x8x32xf32, #tpu.memory_space<vmem>>) attributes {dimension_semantics = [#tpu.dimension_semantics<parallel>], iteration_bounds = array<i64: 1>, scalar_prefetch = 0 : i64, scratch_operands = 0 : i64, tpu.core_type = #tpu.core_type<tc>, window_params = [{transform_indices = @transform_0, window_bounds = array<i64: 2, 8, 32>}, {transform_indices = @transform_1, window_bounds = array<i64: 2, 8, 8>}, {pipeline_mode = #tpu.pipeline_mode<synchronous>, transform_indices = @transform_2, window_bounds = array<i64: 2, 32>}, {pipeline_mode = #tpu.pipeline_mode<synchronous>, transform_indices = @transform_3, window_bounds = array<i64: 2, 32>}, {pipeline_mode = #tpu.pipeline_mode<synchronous>, transform_indices = @transform_4, window_bounds = array<i64: 2, 32, 32>}, {pipeline_mode = #tpu.pipeline_mode<synchronous>, transform_indices = @transform_5, window_bounds = array<i64: 2, 32>}, {pipeline_mode = #tpu.pipeline_mode<synchronous>, transform_indices = @transform_6, window_bounds = array<i64: 2, 32, 64>}, {pipeline_mode = #tpu.pipeline_mode<synchronous>, transform_indices = @transform_7, window_bounds = array<i64: 2, 64>}, {pipeline_mode = #tpu.pipeline_mode<synchronous>, transform_indices = @transform_8, window_bounds = array<i64: 2, 32, 32>}, {pipeline_mode = #tpu.pipeline_mode<synchronous>, transform_indices = @transform_9, window_bounds = array<i64: 2, 32>}, {pipeline_mode = #tpu.pipeline_mode<synchronous>, transform_indices = @transform_10, window_bounds = array<i64: 1, 32>}, {pipeline_mode = #tpu.pipeline_mode<synchronous>, transform_indices = @transform_11, window_bounds = array<i64: 1, 32>}, {transform_indices = @transform_12, window_bounds = array<i64: 2, 8, 32>}]} {
    %c0 = arith.constant 0 : index
    %c0_0 = arith.constant 0 : index
    %c0_1 = arith.constant 0 : index
    %0 = vector.load %arg1[%c0, %c0_0, %c0_1] : memref<2x8x32xf32, #tpu.memory_space<vmem>>, vector<2x8x32xf32>
    %1 = vector.shape_cast %0 : vector<2x8x32xf32> to vector<16x32xf32>
    %c0_2 = arith.constant 0 : index
    %c0_3 = arith.constant 0 : index
    %c0_4 = arith.constant 0 : index
    %2 = vector.load %arg2[%c0_2, %c0_3, %c0_4] : memref<2x8x8xf32, #tpu.memory_space<vmem>>, vector<2x8x8xf32>
    %cst = arith.constant 0.000000e+00 : f32
    %3 = vector.broadcast %cst : f32 to vector<2x8x8xf32>
    %4 = arith.cmpf oeq, %2, %3 : vector<2x8x8xf32>
    %cst_5 = arith.constant -1.000000e+09 : f32
    %cst_6 = arith.constant 0.000000e+00 : f32
    %5 = vector.broadcast %cst_5 : f32 to vector<2x8x8xf32>
    %6 = vector.broadcast %cst_6 : f32 to vector<2x8x8xf32>
    %7 = arith.select %4, %5, %6 : vector<2x8x8xi1>, vector<2x8x8xf32>
    %c0_7 = arith.constant 0 : index
    %c0_8 = arith.constant 0 : index
    %8 = vector.load %arg3[%c0_7, %c0_8] : memref<2x32xf32, #tpu.memory_space<vmem>>, vector<1x32xf32>
    %9 = vector.shape_cast %8 : vector<1x32xf32> to vector<32xf32>
    %c0_9 = arith.constant 0 : index
    %c0_10 = arith.constant 0 : index
    %10 = vector.load %arg4[%c0_9, %c0_10] : memref<2x32xf32, #tpu.memory_space<vmem>>, vector<1x32xf32>
    %11 = vector.shape_cast %10 : vector<1x32xf32> to vector<32xf32>
    %cst_11 = arith.constant dense<0.000000e+00> : vector<16xf32>
    %12 = vector.multi_reduction <add>, %1, %cst_11 [1] : vector<16x32xf32> to vector<16xf32>
    %13 = vector.shape_cast %12 : vector<16xf32> to vector<16x1xf32>
    %cst_12 = arith.constant 3.200000e+01 : f32
    %14 = vector.broadcast %cst_12 : f32 to vector<16x1xf32>
    %15 = arith.divf %13, %14 : vector<16x1xf32>
    %16 = vector.broadcast %15 : vector<16x1xf32> to vector<16x32xf32>
    %17 = arith.subf %1, %16 : vector<16x32xf32>
    %18 = arith.mulf %17, %17 : vector<16x32xf32>
    %cst_13 = arith.constant dense<0.000000e+00> : vector<16xf32>
    %19 = vector.multi_reduction <add>, %18, %cst_13 [1] : vector<16x32xf32> to vector<16xf32>
    %20 = vector.shape_cast %19 : vector<16xf32> to vector<16x1xf32>
    %cst_14 = arith.constant 3.100000e+01 : f32
    %21 = vector.broadcast %cst_14 : f32 to vector<16x1xf32>
    %22 = arith.divf %20, %21 : vector<16x1xf32>
    %23 = math.sqrt %22 : vector<16x1xf32>
    %cst_15 = arith.constant 9.99999997E-7 : f32
    %24 = vector.broadcast %cst_15 : f32 to vector<16x1xf32>
    %25 = arith.addf %23, %24 : vector<16x1xf32>
    %26 = tpu.reciprocal %25 : vector<16x1xf32> -> vector<16x1xf32>
    %27 = vector.broadcast %26 : vector<16x1xf32> to vector<16x32xf32>
    %28 = arith.mulf %17, %27 : vector<16x32xf32>
    %29 = vector.shape_cast %9 : vector<32xf32> to vector<1x32xf32>
    %30 = vector.broadcast %29 : vector<1x32xf32> to vector<16x32xf32>
    %31 = arith.mulf %30, %28 : vector<16x32xf32>
    %32 = vector.shape_cast %11 : vector<32xf32> to vector<1x32xf32>
    %33 = vector.broadcast %32 : vector<1x32xf32> to vector<16x32xf32>
    %34 = arith.addf %31, %33 : vector<16x32xf32>
    %c0_16 = arith.constant 0 : index
    %c0_17 = arith.constant 0 : index
    %c0_18 = arith.constant 0 : index
    %35 = vector.load %arg5[%c0_16, %c0_17, %c0_18] : memref<2x32x32xf32, #tpu.memory_space<vmem>>, vector<1x32x32xf32>
    %36 = vector.shape_cast %35 : vector<1x32x32xf32> to vector<32x32xf32>
    %cst_19 = arith.constant dense<0.000000e+00> : vector<16x32xf32>
    %37 = tpu.matmul %34, %36, %cst_19 {dimension_numbers = #tpu.dot_dimension_numbers<[1], [0], [0], [1], [0, 0, 1, 1], [], []>} : vector<16x32xf32>, vector<32x32xf32>, vector<16x32xf32> -> vector<16x32xf32>
    %c0_20 = arith.constant 0 : index
    %c0_21 = arith.constant 0 : index
    %38 = vector.load %arg6[%c0_20, %c0_21] : memref<2x32xf32, #tpu.memory_space<vmem>>, vector<1x32xf32>
    %39 = vector.shape_cast %38 : vector<1x32xf32> to vector<32xf32>
    %40 = vector.shape_cast %39 : vector<32xf32> to vector<1x32xf32>
    %41 = vector.broadcast %40 : vector<1x32xf32> to vector<16x32xf32>
    %42 = arith.addf %37, %41 : vector<16x32xf32>
    %c0_22 = arith.constant 0 : index
    %c0_23 = arith.constant 0 : index
    %c0_24 = arith.constant 0 : index
    %43 = vector.load %arg7[%c0_22, %c0_23, %c0_24] : memref<2x32x64xf32, #tpu.memory_space<vmem>>, vector<1x32x64xf32>
    %44 = vector.shape_cast %43 : vector<1x32x64xf32> to vector<32x64xf32>
    %cst_25 = arith.constant dense<0.000000e+00> : vector<16x64xf32>
    %45 = tpu.matmul %1, %44, %cst_25 {dimension_numbers = #tpu.dot_dimension_numbers<[1], [0], [0], [1], [0, 0, 1, 1], [], []>} : vector<16x32xf32>, vector<32x64xf32>, vector<16x64xf32> -> vector<16x64xf32>
    %c0_26 = arith.constant 0 : index
    %c0_27 = arith.constant 0 : index
    %46 = vector.load %arg8[%c0_26, %c0_27] : memref<2x64xf32, #tpu.memory_space<vmem>>, vector<1x64xf32>
    %47 = vector.shape_cast %46 : vector<1x64xf32> to vector<64xf32>
    %48 = vector.shape_cast %47 : vector<64xf32> to vector<1x64xf32>
    %49 = vector.broadcast %48 : vector<1x64xf32> to vector<16x64xf32>
    %50 = arith.addf %45, %49 : vector<16x64xf32>
    %51 = vector.extract_strided_slice %50 {offsets = [0, 0], sizes = [16, 32], strides = [1, 1]} : vector<16x64xf32> to vector<16x32xf32>
    %52 = vector.extract_strided_slice %50 {offsets = [0, 32], sizes = [16, 32], strides = [1, 1]} : vector<16x64xf32> to vector<16x32xf32>
    %53 = vector.extract_strided_slice %42 {offsets = [0, 0], sizes = [8, 32], strides = [1, 1]} : vector<16x32xf32> to vector<8x32xf32>
    %54 = vector.extract_strided_slice %52 {offsets = [0, 0], sizes = [8, 32], strides = [1, 1]} : vector<16x32xf32> to vector<8x32xf32>
    %55 = vector.extract_strided_slice %51 {offsets = [0, 0], sizes = [8, 32], strides = [1, 1]} : vector<16x32xf32> to vector<8x32xf32>
    %56 = tpu.transpose %55, [1, 0] : vector<8x32xf32> -> vector<32x8xf32>
    %57 = vector.extract_strided_slice %7 {offsets = [0, 0, 0], sizes = [1, 8, 8], strides = [1, 1, 1]} : vector<2x8x8xf32> to vector<1x8x8xf32>
    %58 = vector.shape_cast %57 : vector<1x8x8xf32> to vector<8x8xf32>
    %59 = vector.extract_strided_slice %53 {offsets = [0, 0], sizes = [8, 8], strides = [1, 1]} : vector<8x32xf32> to vector<8x8xf32>
    %60 = vector.extract_strided_slice %56 {offsets = [0, 0], sizes = [8, 8], strides = [1, 1]} : vector<32x8xf32> to vector<8x8xf32>
    %cst_28 = arith.constant dense<0.000000e+00> : vector<8x8xf32>
    %61 = tpu.matmul %59, %60, %cst_28 {dimension_numbers = #tpu.dot_dimension_numbers<[1], [0], [0], [1], [0, 0, 1, 1], [], []>} : vector<8x8xf32>, vector<8x8xf32>, vector<8x8xf32> -> vector<8x8xf32>
    %cst_29 = arith.constant 0.353553385 : f32
    %62 = vector.broadcast %cst_29 : f32 to vector<8x8xf32>
    %63 = arith.mulf %61, %62 : vector<8x8xf32>
    %64 = arith.addf %63, %58 : vector<8x8xf32>
    %cst_30 = arith.constant dense<0xFF800000> : vector<8xf32>
    %65 = vector.multi_reduction <maximumf>, %64, %cst_30 [1] : vector<8x8xf32> to vector<8xf32>
    %66 = vector.shape_cast %65 : vector<8xf32> to vector<8x1xf32>
    %67 = vector.broadcast %66 : vector<8x1xf32> to vector<8x8xf32>
    %68 = arith.subf %64, %67 : vector<8x8xf32>
    %69 = math.exp %68 : vector<8x8xf32>
    %cst_31 = arith.constant dense<0.000000e+00> : vector<8xf32>
    %70 = vector.multi_reduction <add>, %69, %cst_31 [1] : vector<8x8xf32> to vector<8xf32>
    %71 = vector.shape_cast %70 : vector<8xf32> to vector<8x1xf32>
    %72 = tpu.reciprocal %71 : vector<8x1xf32> -> vector<8x1xf32>
    %73 = vector.broadcast %72 : vector<8x1xf32> to vector<8x8xf32>
    %74 = arith.mulf %69, %73 : vector<8x8xf32>
    %75 = vector.extract_strided_slice %54 {offsets = [0, 0], sizes = [8, 8], strides = [1, 1]} : vector<8x32xf32> to vector<8x8xf32>
    %cst_32 = arith.constant dense<0.000000e+00> : vector<8x8xf32>
    %76 = tpu.matmul %74, %75, %cst_32 {dimension_numbers = #tpu.dot_dimension_numbers<[1], [0], [0], [1], [0, 0, 1, 1], [], []>} : vector<8x8xf32>, vector<8x8xf32>, vector<8x8xf32> -> vector<8x8xf32>
    %77 = vector.extract_strided_slice %53 {offsets = [0, 8], sizes = [8, 8], strides = [1, 1]} : vector<8x32xf32> to vector<8x8xf32>
    %78 = vector.extract_strided_slice %56 {offsets = [8, 0], sizes = [8, 8], strides = [1, 1]} : vector<32x8xf32> to vector<8x8xf32>
    %cst_33 = arith.constant dense<0.000000e+00> : vector<8x8xf32>
    %79 = tpu.matmul %77, %78, %cst_33 {dimension_numbers = #tpu.dot_dimension_numbers<[1], [0], [0], [1], [0, 0, 1, 1], [], []>} : vector<8x8xf32>, vector<8x8xf32>, vector<8x8xf32> -> vector<8x8xf32>
    %cst_34 = arith.constant 0.353553385 : f32
    %80 = vector.broadcast %cst_34 : f32 to vector<8x8xf32>
    %81 = arith.mulf %79, %80 : vector<8x8xf32>
    %82 = arith.addf %81, %58 : vector<8x8xf32>
    %cst_35 = arith.constant dense<0xFF800000> : vector<8xf32>
    %83 = vector.multi_reduction <maximumf>, %82, %cst_35 [1] : vector<8x8xf32> to vector<8xf32>
    %84 = vector.shape_cast %83 : vector<8xf32> to vector<8x1xf32>
    %85 = vector.broadcast %84 : vector<8x1xf32> to vector<8x8xf32>
    %86 = arith.subf %82, %85 : vector<8x8xf32>
    %87 = math.exp %86 : vector<8x8xf32>
    %cst_36 = arith.constant dense<0.000000e+00> : vector<8xf32>
    %88 = vector.multi_reduction <add>, %87, %cst_36 [1] : vector<8x8xf32> to vector<8xf32>
    %89 = vector.shape_cast %88 : vector<8xf32> to vector<8x1xf32>
    %90 = tpu.reciprocal %89 : vector<8x1xf32> -> vector<8x1xf32>
    %91 = vector.broadcast %90 : vector<8x1xf32> to vector<8x8xf32>
    %92 = arith.mulf %87, %91 : vector<8x8xf32>
    %93 = vector.extract_strided_slice %54 {offsets = [0, 8], sizes = [8, 8], strides = [1, 1]} : vector<8x32xf32> to vector<8x8xf32>
    %cst_37 = arith.constant dense<0.000000e+00> : vector<8x8xf32>
    %94 = tpu.matmul %92, %93, %cst_37 {dimension_numbers = #tpu.dot_dimension_numbers<[1], [0], [0], [1], [0, 0, 1, 1], [], []>} : vector<8x8xf32>, vector<8x8xf32>, vector<8x8xf32> -> vector<8x8xf32>
    %95 = vector.extract_strided_slice %53 {offsets = [0, 16], sizes = [8, 8], strides = [1, 1]} : vector<8x32xf32> to vector<8x8xf32>
    %96 = vector.extract_strided_slice %56 {offsets = [16, 0], sizes = [8, 8], strides = [1, 1]} : vector<32x8xf32> to vector<8x8xf32>
    %cst_38 = arith.constant dense<0.000000e+00> : vector<8x8xf32>
    %97 = tpu.matmul %95, %96, %cst_38 {dimension_numbers = #tpu.dot_dimension_numbers<[1], [0], [0], [1], [0, 0, 1, 1], [], []>} : vector<8x8xf32>, vector<8x8xf32>, vector<8x8xf32> -> vector<8x8xf32>
    %cst_39 = arith.constant 0.353553385 : f32
    %98 = vector.broadcast %cst_39 : f32 to vector<8x8xf32>
    %99 = arith.mulf %97, %98 : vector<8x8xf32>
    %100 = arith.addf %99, %58 : vector<8x8xf32>
    %cst_40 = arith.constant dense<0xFF800000> : vector<8xf32>
    %101 = vector.multi_reduction <maximumf>, %100, %cst_40 [1] : vector<8x8xf32> to vector<8xf32>
    %102 = vector.shape_cast %101 : vector<8xf32> to vector<8x1xf32>
    %103 = vector.broadcast %102 : vector<8x1xf32> to vector<8x8xf32>
    %104 = arith.subf %100, %103 : vector<8x8xf32>
    %105 = math.exp %104 : vector<8x8xf32>
    %cst_41 = arith.constant dense<0.000000e+00> : vector<8xf32>
    %106 = vector.multi_reduction <add>, %105, %cst_41 [1] : vector<8x8xf32> to vector<8xf32>
    %107 = vector.shape_cast %106 : vector<8xf32> to vector<8x1xf32>
    %108 = tpu.reciprocal %107 : vector<8x1xf32> -> vector<8x1xf32>
    %109 = vector.broadcast %108 : vector<8x1xf32> to vector<8x8xf32>
    %110 = arith.mulf %105, %109 : vector<8x8xf32>
    %111 = vector.extract_strided_slice %54 {offsets = [0, 16], sizes = [8, 8], strides = [1, 1]} : vector<8x32xf32> to vector<8x8xf32>
    %cst_42 = arith.constant dense<0.000000e+00> : vector<8x8xf32>
    %112 = tpu.matmul %110, %111, %cst_42 {dimension_numbers = #tpu.dot_dimension_numbers<[1], [0], [0], [1], [0, 0, 1, 1], [], []>} : vector<8x8xf32>, vector<8x8xf32>, vector<8x8xf32> -> vector<8x8xf32>
    %113 = vector.extract_strided_slice %53 {offsets = [0, 24], sizes = [8, 8], strides = [1, 1]} : vector<8x32xf32> to vector<8x8xf32>
    %114 = vector.extract_strided_slice %56 {offsets = [24, 0], sizes = [8, 8], strides = [1, 1]} : vector<32x8xf32> to vector<8x8xf32>
    %cst_43 = arith.constant dense<0.000000e+00> : vector<8x8xf32>
    %115 = tpu.matmul %113, %114, %cst_43 {dimension_numbers = #tpu.dot_dimension_numbers<[1], [0], [0], [1], [0, 0, 1, 1], [], []>} : vector<8x8xf32>, vector<8x8xf32>, vector<8x8xf32> -> vector<8x8xf32>
    %cst_44 = arith.constant 0.353553385 : f32
    %116 = vector.broadcast %cst_44 : f32 to vector<8x8xf32>
    %117 = arith.mulf %115, %116 : vector<8x8xf32>
    %118 = arith.addf %117, %58 : vector<8x8xf32>
    %cst_45 = arith.constant dense<0xFF800000> : vector<8xf32>
    %119 = vector.multi_reduction <maximumf>, %118, %cst_45 [1] : vector<8x8xf32> to vector<8xf32>
    %120 = vector.shape_cast %119 : vector<8xf32> to vector<8x1xf32>
    %121 = vector.broadcast %120 : vector<8x1xf32> to vector<8x8xf32>
    %122 = arith.subf %118, %121 : vector<8x8xf32>
    %123 = math.exp %122 : vector<8x8xf32>
    %cst_46 = arith.constant dense<0.000000e+00> : vector<8xf32>
    %124 = vector.multi_reduction <add>, %123, %cst_46 [1] : vector<8x8xf32> to vector<8xf32>
    %125 = vector.shape_cast %124 : vector<8xf32> to vector<8x1xf32>
    %126 = tpu.reciprocal %125 : vector<8x1xf32> -> vector<8x1xf32>
    %127 = vector.broadcast %126 : vector<8x1xf32> to vector<8x8xf32>
    %128 = arith.mulf %123, %127 : vector<8x8xf32>
    %129 = vector.extract_strided_slice %54 {offsets = [0, 24], sizes = [8, 8], strides = [1, 1]} : vector<8x32xf32> to vector<8x8xf32>
    %cst_47 = arith.constant dense<0.000000e+00> : vector<8x8xf32>
    %130 = tpu.matmul %128, %129, %cst_47 {dimension_numbers = #tpu.dot_dimension_numbers<[1], [0], [0], [1], [0, 0, 1, 1], [], []>} : vector<8x8xf32>, vector<8x8xf32>, vector<8x8xf32> -> vector<8x8xf32>
    %131 = tpu.concatenate %76, %94, %112, %130 in 1 : vector<8x8xf32>, vector<8x8xf32>, vector<8x8xf32>, vector<8x8xf32> -> vector<8x32xf32>
    %132 = vector.extract_strided_slice %42 {offsets = [8, 0], sizes = [8, 32], strides = [1, 1]} : vector<16x32xf32> to vector<8x32xf32>
    %133 = vector.extract_strided_slice %52 {offsets = [8, 0], sizes = [8, 32], strides = [1, 1]} : vector<16x32xf32> to vector<8x32xf32>
    %134 = vector.extract_strided_slice %51 {offsets = [8, 0], sizes = [8, 32], strides = [1, 1]} : vector<16x32xf32> to vector<8x32xf32>
    %135 = tpu.transpose %134, [1, 0] : vector<8x32xf32> -> vector<32x8xf32>
    %136 = vector.extract_strided_slice %7 {offsets = [1, 0, 0], sizes = [1, 8, 8], strides = [1, 1, 1]} : vector<2x8x8xf32> to vector<1x8x8xf32>
    %137 = vector.shape_cast %136 : vector<1x8x8xf32> to vector<8x8xf32>
    %138 = vector.extract_strided_slice %132 {offsets = [0, 0], sizes = [8, 8], strides = [1, 1]} : vector<8x32xf32> to vector<8x8xf32>
    %139 = vector.extract_strided_slice %135 {offsets = [0, 0], sizes = [8, 8], strides = [1, 1]} : vector<32x8xf32> to vector<8x8xf32>
    %cst_48 = arith.constant dense<0.000000e+00> : vector<8x8xf32>
    %140 = tpu.matmul %138, %139, %cst_48 {dimension_numbers = #tpu.dot_dimension_numbers<[1], [0], [0], [1], [0, 0, 1, 1], [], []>} : vector<8x8xf32>, vector<8x8xf32>, vector<8x8xf32> -> vector<8x8xf32>
    %cst_49 = arith.constant 0.353553385 : f32
    %141 = vector.broadcast %cst_49 : f32 to vector<8x8xf32>
    %142 = arith.mulf %140, %141 : vector<8x8xf32>
    %143 = arith.addf %142, %137 : vector<8x8xf32>
    %cst_50 = arith.constant dense<0xFF800000> : vector<8xf32>
    %144 = vector.multi_reduction <maximumf>, %143, %cst_50 [1] : vector<8x8xf32> to vector<8xf32>
    %145 = vector.shape_cast %144 : vector<8xf32> to vector<8x1xf32>
    %146 = vector.broadcast %145 : vector<8x1xf32> to vector<8x8xf32>
    %147 = arith.subf %143, %146 : vector<8x8xf32>
    %148 = math.exp %147 : vector<8x8xf32>
    %cst_51 = arith.constant dense<0.000000e+00> : vector<8xf32>
    %149 = vector.multi_reduction <add>, %148, %cst_51 [1] : vector<8x8xf32> to vector<8xf32>
    %150 = vector.shape_cast %149 : vector<8xf32> to vector<8x1xf32>
    %151 = tpu.reciprocal %150 : vector<8x1xf32> -> vector<8x1xf32>
    %152 = vector.broadcast %151 : vector<8x1xf32> to vector<8x8xf32>
    %153 = arith.mulf %148, %152 : vector<8x8xf32>
    %154 = vector.extract_strided_slice %133 {offsets = [0, 0], sizes = [8, 8], strides = [1, 1]} : vector<8x32xf32> to vector<8x8xf32>
    %cst_52 = arith.constant dense<0.000000e+00> : vector<8x8xf32>
    %155 = tpu.matmul %153, %154, %cst_52 {dimension_numbers = #tpu.dot_dimension_numbers<[1], [0], [0], [1], [0, 0, 1, 1], [], []>} : vector<8x8xf32>, vector<8x8xf32>, vector<8x8xf32> -> vector<8x8xf32>
    %156 = vector.extract_strided_slice %132 {offsets = [0, 8], sizes = [8, 8], strides = [1, 1]} : vector<8x32xf32> to vector<8x8xf32>
    %157 = vector.extract_strided_slice %135 {offsets = [8, 0], sizes = [8, 8], strides = [1, 1]} : vector<32x8xf32> to vector<8x8xf32>
    %cst_53 = arith.constant dense<0.000000e+00> : vector<8x8xf32>
    %158 = tpu.matmul %156, %157, %cst_53 {dimension_numbers = #tpu.dot_dimension_numbers<[1], [0], [0], [1], [0, 0, 1, 1], [], []>} : vector<8x8xf32>, vector<8x8xf32>, vector<8x8xf32> -> vector<8x8xf32>
    %cst_54 = arith.constant 0.353553385 : f32
    %159 = vector.broadcast %cst_54 : f32 to vector<8x8xf32>
    %160 = arith.mulf %158, %159 : vector<8x8xf32>
    %161 = arith.addf %160, %137 : vector<8x8xf32>
    %cst_55 = arith.constant dense<0xFF800000> : vector<8xf32>
    %162 = vector.multi_reduction <maximumf>, %161, %cst_55 [1] : vector<8x8xf32> to vector<8xf32>
    %163 = vector.shape_cast %162 : vector<8xf32> to vector<8x1xf32>
    %164 = vector.broadcast %163 : vector<8x1xf32> to vector<8x8xf32>
    %165 = arith.subf %161, %164 : vector<8x8xf32>
    %166 = math.exp %165 : vector<8x8xf32>
    %cst_56 = arith.constant dense<0.000000e+00> : vector<8xf32>
    %167 = vector.multi_reduction <add>, %166, %cst_56 [1] : vector<8x8xf32> to vector<8xf32>
    %168 = vector.shape_cast %167 : vector<8xf32> to vector<8x1xf32>
    %169 = tpu.reciprocal %168 : vector<8x1xf32> -> vector<8x1xf32>
    %170 = vector.broadcast %169 : vector<8x1xf32> to vector<8x8xf32>
    %171 = arith.mulf %166, %170 : vector<8x8xf32>
    %172 = vector.extract_strided_slice %133 {offsets = [0, 8], sizes = [8, 8], strides = [1, 1]} : vector<8x32xf32> to vector<8x8xf32>
    %cst_57 = arith.constant dense<0.000000e+00> : vector<8x8xf32>
    %173 = tpu.matmul %171, %172, %cst_57 {dimension_numbers = #tpu.dot_dimension_numbers<[1], [0], [0], [1], [0, 0, 1, 1], [], []>} : vector<8x8xf32>, vector<8x8xf32>, vector<8x8xf32> -> vector<8x8xf32>
    %174 = vector.extract_strided_slice %132 {offsets = [0, 16], sizes = [8, 8], strides = [1, 1]} : vector<8x32xf32> to vector<8x8xf32>
    %175 = vector.extract_strided_slice %135 {offsets = [16, 0], sizes = [8, 8], strides = [1, 1]} : vector<32x8xf32> to vector<8x8xf32>
    %cst_58 = arith.constant dense<0.000000e+00> : vector<8x8xf32>
    %176 = tpu.matmul %174, %175, %cst_58 {dimension_numbers = #tpu.dot_dimension_numbers<[1], [0], [0], [1], [0, 0, 1, 1], [], []>} : vector<8x8xf32>, vector<8x8xf32>, vector<8x8xf32> -> vector<8x8xf32>
    %cst_59 = arith.constant 0.353553385 : f32
    %177 = vector.broadcast %cst_59 : f32 to vector<8x8xf32>
    %178 = arith.mulf %176, %177 : vector<8x8xf32>
    %179 = arith.addf %178, %137 : vector<8x8xf32>
    %cst_60 = arith.constant dense<0xFF800000> : vector<8xf32>
    %180 = vector.multi_reduction <maximumf>, %179, %cst_60 [1] : vector<8x8xf32> to vector<8xf32>
    %181 = vector.shape_cast %180 : vector<8xf32> to vector<8x1xf32>
    %182 = vector.broadcast %181 : vector<8x1xf32> to vector<8x8xf32>
    %183 = arith.subf %179, %182 : vector<8x8xf32>
    %184 = math.exp %183 : vector<8x8xf32>
    %cst_61 = arith.constant dense<0.000000e+00> : vector<8xf32>
    %185 = vector.multi_reduction <add>, %184, %cst_61 [1] : vector<8x8xf32> to vector<8xf32>
    %186 = vector.shape_cast %185 : vector<8xf32> to vector<8x1xf32>
    %187 = tpu.reciprocal %186 : vector<8x1xf32> -> vector<8x1xf32>
    %188 = vector.broadcast %187 : vector<8x1xf32> to vector<8x8xf32>
    %189 = arith.mulf %184, %188 : vector<8x8xf32>
    %190 = vector.extract_strided_slice %133 {offsets = [0, 16], sizes = [8, 8], strides = [1, 1]} : vector<8x32xf32> to vector<8x8xf32>
    %cst_62 = arith.constant dense<0.000000e+00> : vector<8x8xf32>
    %191 = tpu.matmul %189, %190, %cst_62 {dimension_numbers = #tpu.dot_dimension_numbers<[1], [0], [0], [1], [0, 0, 1, 1], [], []>} : vector<8x8xf32>, vector<8x8xf32>, vector<8x8xf32> -> vector<8x8xf32>
    %192 = vector.extract_strided_slice %132 {offsets = [0, 24], sizes = [8, 8], strides = [1, 1]} : vector<8x32xf32> to vector<8x8xf32>
    %193 = vector.extract_strided_slice %135 {offsets = [24, 0], sizes = [8, 8], strides = [1, 1]} : vector<32x8xf32> to vector<8x8xf32>
    %cst_63 = arith.constant dense<0.000000e+00> : vector<8x8xf32>
    %194 = tpu.matmul %192, %193, %cst_63 {dimension_numbers = #tpu.dot_dimension_numbers<[1], [0], [0], [1], [0, 0, 1, 1], [], []>} : vector<8x8xf32>, vector<8x8xf32>, vector<8x8xf32> -> vector<8x8xf32>
    %cst_64 = arith.constant 0.353553385 : f32
    %195 = vector.broadcast %cst_64 : f32 to vector<8x8xf32>
    %196 = arith.mulf %194, %195 : vector<8x8xf32>
    %197 = arith.addf %196, %137 : vector<8x8xf32>
    %cst_65 = arith.constant dense<0xFF800000> : vector<8xf32>
    %198 = vector.multi_reduction <maximumf>, %197, %cst_65 [1] : vector<8x8xf32> to vector<8xf32>
    %199 = vector.shape_cast %198 : vector<8xf32> to vector<8x1xf32>
    %200 = vector.broadcast %199 : vector<8x1xf32> to vector<8x8xf32>
    %201 = arith.subf %197, %200 : vector<8x8xf32>
    %202 = math.exp %201 : vector<8x8xf32>
    %cst_66 = arith.constant dense<0.000000e+00> : vector<8xf32>
    %203 = vector.multi_reduction <add>, %202, %cst_66 [1] : vector<8x8xf32> to vector<8xf32>
    %204 = vector.shape_cast %203 : vector<8xf32> to vector<8x1xf32>
    %205 = tpu.reciprocal %204 : vector<8x1xf32> -> vector<8x1xf32>
    %206 = vector.broadcast %205 : vector<8x1xf32> to vector<8x8xf32>
    %207 = arith.mulf %202, %206 : vector<8x8xf32>
    %208 = vector.extract_strided_slice %133 {offsets = [0, 24], sizes = [8, 8], strides = [1, 1]} : vector<8x32xf32> to vector<8x8xf32>
    %cst_67 = arith.constant dense<0.000000e+00> : vector<8x8xf32>
    %209 = tpu.matmul %207, %208, %cst_67 {dimension_numbers = #tpu.dot_dimension_numbers<[1], [0], [0], [1], [0, 0, 1, 1], [], []>} : vector<8x8xf32>, vector<8x8xf32>, vector<8x8xf32> -> vector<8x8xf32>
    %210 = tpu.concatenate %155, %173, %191, %209 in 1 : vector<8x8xf32>, vector<8x8xf32>, vector<8x8xf32>, vector<8x8xf32> -> vector<8x32xf32>
    %211 = tpu.concatenate %131, %210 in 0 : vector<8x32xf32>, vector<8x32xf32> -> vector<16x32xf32>
    %c0_68 = arith.constant 0 : index
    %c0_69 = arith.constant 0 : index
    %c0_70 = arith.constant 0 : index
    %212 = vector.load %arg9[%c0_68, %c0_69, %c0_70] : memref<2x32x32xf32, #tpu.memory_space<vmem>>, vector<1x32x32xf32>
    %213 = vector.shape_cast %212 : vector<1x32x32xf32> to vector<32x32xf32>
    %cst_71 = arith.constant dense<0.000000e+00> : vector<16x32xf32>
    %214 = tpu.matmul %211, %213, %cst_71 {dimension_numbers = #tpu.dot_dimension_numbers<[1], [0], [0], [1], [0, 0, 1, 1], [], []>} : vector<16x32xf32>, vector<32x32xf32>, vector<16x32xf32> -> vector<16x32xf32>
    %c0_72 = arith.constant 0 : index
    %c0_73 = arith.constant 0 : index
    %215 = vector.load %arg10[%c0_72, %c0_73] : memref<2x32xf32, #tpu.memory_space<vmem>>, vector<1x32xf32>
    %216 = vector.shape_cast %215 : vector<1x32xf32> to vector<32xf32>
    %217 = vector.shape_cast %216 : vector<32xf32> to vector<1x32xf32>
    %218 = vector.broadcast %217 : vector<1x32xf32> to vector<16x32xf32>
    %219 = arith.addf %214, %218 : vector<16x32xf32>
    %220 = arith.addf %1, %219 : vector<16x32xf32>
    %c1 = arith.constant 1 : index
    %c0_74 = arith.constant 0 : index
    %221 = vector.load %arg3[%c1, %c0_74] : memref<2x32xf32, #tpu.memory_space<vmem>>, vector<1x32xf32>
    %222 = vector.shape_cast %221 : vector<1x32xf32> to vector<32xf32>
    %c1_75 = arith.constant 1 : index
    %c0_76 = arith.constant 0 : index
    %223 = vector.load %arg4[%c1_75, %c0_76] : memref<2x32xf32, #tpu.memory_space<vmem>>, vector<1x32xf32>
    %224 = vector.shape_cast %223 : vector<1x32xf32> to vector<32xf32>
    %cst_77 = arith.constant dense<0.000000e+00> : vector<16xf32>
    %225 = vector.multi_reduction <add>, %220, %cst_77 [1] : vector<16x32xf32> to vector<16xf32>
    %226 = vector.shape_cast %225 : vector<16xf32> to vector<16x1xf32>
    %cst_78 = arith.constant 3.200000e+01 : f32
    %227 = vector.broadcast %cst_78 : f32 to vector<16x1xf32>
    %228 = arith.divf %226, %227 : vector<16x1xf32>
    %229 = vector.broadcast %228 : vector<16x1xf32> to vector<16x32xf32>
    %230 = arith.subf %220, %229 : vector<16x32xf32>
    %231 = arith.mulf %230, %230 : vector<16x32xf32>
    %cst_79 = arith.constant dense<0.000000e+00> : vector<16xf32>
    %232 = vector.multi_reduction <add>, %231, %cst_79 [1] : vector<16x32xf32> to vector<16xf32>
    %233 = vector.shape_cast %232 : vector<16xf32> to vector<16x1xf32>
    %cst_80 = arith.constant 3.100000e+01 : f32
    %234 = vector.broadcast %cst_80 : f32 to vector<16x1xf32>
    %235 = arith.divf %233, %234 : vector<16x1xf32>
    %236 = math.sqrt %235 : vector<16x1xf32>
    %cst_81 = arith.constant 9.99999997E-7 : f32
    %237 = vector.broadcast %cst_81 : f32 to vector<16x1xf32>
    %238 = arith.addf %236, %237 : vector<16x1xf32>
    %239 = tpu.reciprocal %238 : vector<16x1xf32> -> vector<16x1xf32>
    %240 = vector.broadcast %239 : vector<16x1xf32> to vector<16x32xf32>
    %241 = arith.mulf %230, %240 : vector<16x32xf32>
    %242 = vector.shape_cast %222 : vector<32xf32> to vector<1x32xf32>
    %243 = vector.broadcast %242 : vector<1x32xf32> to vector<16x32xf32>
    %244 = arith.mulf %243, %241 : vector<16x32xf32>
    %245 = vector.shape_cast %224 : vector<32xf32> to vector<1x32xf32>
    %246 = vector.broadcast %245 : vector<1x32xf32> to vector<16x32xf32>
    %247 = arith.addf %244, %246 : vector<16x32xf32>
    %c1_82 = arith.constant 1 : index
    %c0_83 = arith.constant 0 : index
    %c0_84 = arith.constant 0 : index
    %248 = vector.load %arg5[%c1_82, %c0_83, %c0_84] : memref<2x32x32xf32, #tpu.memory_space<vmem>>, vector<1x32x32xf32>
    %249 = vector.shape_cast %248 : vector<1x32x32xf32> to vector<32x32xf32>
    %cst_85 = arith.constant dense<0.000000e+00> : vector<16x32xf32>
    %250 = tpu.matmul %247, %249, %cst_85 {dimension_numbers = #tpu.dot_dimension_numbers<[1], [0], [0], [1], [0, 0, 1, 1], [], []>} : vector<16x32xf32>, vector<32x32xf32>, vector<16x32xf32> -> vector<16x32xf32>
    %c1_86 = arith.constant 1 : index
    %c0_87 = arith.constant 0 : index
    %251 = vector.load %arg6[%c1_86, %c0_87] : memref<2x32xf32, #tpu.memory_space<vmem>>, vector<1x32xf32>
    %252 = vector.shape_cast %251 : vector<1x32xf32> to vector<32xf32>
    %253 = vector.shape_cast %252 : vector<32xf32> to vector<1x32xf32>
    %254 = vector.broadcast %253 : vector<1x32xf32> to vector<16x32xf32>
    %255 = arith.addf %250, %254 : vector<16x32xf32>
    %c1_88 = arith.constant 1 : index
    %c0_89 = arith.constant 0 : index
    %c0_90 = arith.constant 0 : index
    %256 = vector.load %arg7[%c1_88, %c0_89, %c0_90] : memref<2x32x64xf32, #tpu.memory_space<vmem>>, vector<1x32x64xf32>
    %257 = vector.shape_cast %256 : vector<1x32x64xf32> to vector<32x64xf32>
    %cst_91 = arith.constant dense<0.000000e+00> : vector<16x64xf32>
    %258 = tpu.matmul %220, %257, %cst_91 {dimension_numbers = #tpu.dot_dimension_numbers<[1], [0], [0], [1], [0, 0, 1, 1], [], []>} : vector<16x32xf32>, vector<32x64xf32>, vector<16x64xf32> -> vector<16x64xf32>
    %c1_92 = arith.constant 1 : index
    %c0_93 = arith.constant 0 : index
    %259 = vector.load %arg8[%c1_92, %c0_93] : memref<2x64xf32, #tpu.memory_space<vmem>>, vector<1x64xf32>
    %260 = vector.shape_cast %259 : vector<1x64xf32> to vector<64xf32>
    %261 = vector.shape_cast %260 : vector<64xf32> to vector<1x64xf32>
    %262 = vector.broadcast %261 : vector<1x64xf32> to vector<16x64xf32>
    %263 = arith.addf %258, %262 : vector<16x64xf32>
    %264 = vector.extract_strided_slice %263 {offsets = [0, 0], sizes = [16, 32], strides = [1, 1]} : vector<16x64xf32> to vector<16x32xf32>
    %265 = vector.extract_strided_slice %263 {offsets = [0, 32], sizes = [16, 32], strides = [1, 1]} : vector<16x64xf32> to vector<16x32xf32>
    %266 = vector.extract_strided_slice %255 {offsets = [0, 0], sizes = [8, 32], strides = [1, 1]} : vector<16x32xf32> to vector<8x32xf32>
    %267 = vector.extract_strided_slice %265 {offsets = [0, 0], sizes = [8, 32], strides = [1, 1]} : vector<16x32xf32> to vector<8x32xf32>
    %268 = vector.extract_strided_slice %264 {offsets = [0, 0], sizes = [8, 32], strides = [1, 1]} : vector<16x32xf32> to vector<8x32xf32>
    %269 = tpu.transpose %268, [1, 0] : vector<8x32xf32> -> vector<32x8xf32>
    %270 = vector.extract_strided_slice %7 {offsets = [0, 0, 0], sizes = [1, 8, 8], strides = [1, 1, 1]} : vector<2x8x8xf32> to vector<1x8x8xf32>
    %271 = vector.shape_cast %270 : vector<1x8x8xf32> to vector<8x8xf32>
    %272 = vector.extract_strided_slice %266 {offsets = [0, 0], sizes = [8, 8], strides = [1, 1]} : vector<8x32xf32> to vector<8x8xf32>
    %273 = vector.extract_strided_slice %269 {offsets = [0, 0], sizes = [8, 8], strides = [1, 1]} : vector<32x8xf32> to vector<8x8xf32>
    %cst_94 = arith.constant dense<0.000000e+00> : vector<8x8xf32>
    %274 = tpu.matmul %272, %273, %cst_94 {dimension_numbers = #tpu.dot_dimension_numbers<[1], [0], [0], [1], [0, 0, 1, 1], [], []>} : vector<8x8xf32>, vector<8x8xf32>, vector<8x8xf32> -> vector<8x8xf32>
    %cst_95 = arith.constant 0.353553385 : f32
    %275 = vector.broadcast %cst_95 : f32 to vector<8x8xf32>
    %276 = arith.mulf %274, %275 : vector<8x8xf32>
    %277 = arith.addf %276, %271 : vector<8x8xf32>
    %cst_96 = arith.constant dense<0xFF800000> : vector<8xf32>
    %278 = vector.multi_reduction <maximumf>, %277, %cst_96 [1] : vector<8x8xf32> to vector<8xf32>
    %279 = vector.shape_cast %278 : vector<8xf32> to vector<8x1xf32>
    %280 = vector.broadcast %279 : vector<8x1xf32> to vector<8x8xf32>
    %281 = arith.subf %277, %280 : vector<8x8xf32>
    %282 = math.exp %281 : vector<8x8xf32>
    %cst_97 = arith.constant dense<0.000000e+00> : vector<8xf32>
    %283 = vector.multi_reduction <add>, %282, %cst_97 [1] : vector<8x8xf32> to vector<8xf32>
    %284 = vector.shape_cast %283 : vector<8xf32> to vector<8x1xf32>
    %285 = tpu.reciprocal %284 : vector<8x1xf32> -> vector<8x1xf32>
    %286 = vector.broadcast %285 : vector<8x1xf32> to vector<8x8xf32>
    %287 = arith.mulf %282, %286 : vector<8x8xf32>
    %288 = vector.extract_strided_slice %267 {offsets = [0, 0], sizes = [8, 8], strides = [1, 1]} : vector<8x32xf32> to vector<8x8xf32>
    %cst_98 = arith.constant dense<0.000000e+00> : vector<8x8xf32>
    %289 = tpu.matmul %287, %288, %cst_98 {dimension_numbers = #tpu.dot_dimension_numbers<[1], [0], [0], [1], [0, 0, 1, 1], [], []>} : vector<8x8xf32>, vector<8x8xf32>, vector<8x8xf32> -> vector<8x8xf32>
    %290 = vector.extract_strided_slice %266 {offsets = [0, 8], sizes = [8, 8], strides = [1, 1]} : vector<8x32xf32> to vector<8x8xf32>
    %291 = vector.extract_strided_slice %269 {offsets = [8, 0], sizes = [8, 8], strides = [1, 1]} : vector<32x8xf32> to vector<8x8xf32>
    %cst_99 = arith.constant dense<0.000000e+00> : vector<8x8xf32>
    %292 = tpu.matmul %290, %291, %cst_99 {dimension_numbers = #tpu.dot_dimension_numbers<[1], [0], [0], [1], [0, 0, 1, 1], [], []>} : vector<8x8xf32>, vector<8x8xf32>, vector<8x8xf32> -> vector<8x8xf32>
    %cst_100 = arith.constant 0.353553385 : f32
    %293 = vector.broadcast %cst_100 : f32 to vector<8x8xf32>
    %294 = arith.mulf %292, %293 : vector<8x8xf32>
    %295 = arith.addf %294, %271 : vector<8x8xf32>
    %cst_101 = arith.constant dense<0xFF800000> : vector<8xf32>
    %296 = vector.multi_reduction <maximumf>, %295, %cst_101 [1] : vector<8x8xf32> to vector<8xf32>
    %297 = vector.shape_cast %296 : vector<8xf32> to vector<8x1xf32>
    %298 = vector.broadcast %297 : vector<8x1xf32> to vector<8x8xf32>
    %299 = arith.subf %295, %298 : vector<8x8xf32>
    %300 = math.exp %299 : vector<8x8xf32>
    %cst_102 = arith.constant dense<0.000000e+00> : vector<8xf32>
    %301 = vector.multi_reduction <add>, %300, %cst_102 [1] : vector<8x8xf32> to vector<8xf32>
    %302 = vector.shape_cast %301 : vector<8xf32> to vector<8x1xf32>
    %303 = tpu.reciprocal %302 : vector<8x1xf32> -> vector<8x1xf32>
    %304 = vector.broadcast %303 : vector<8x1xf32> to vector<8x8xf32>
    %305 = arith.mulf %300, %304 : vector<8x8xf32>
    %306 = vector.extract_strided_slice %267 {offsets = [0, 8], sizes = [8, 8], strides = [1, 1]} : vector<8x32xf32> to vector<8x8xf32>
    %cst_103 = arith.constant dense<0.000000e+00> : vector<8x8xf32>
    %307 = tpu.matmul %305, %306, %cst_103 {dimension_numbers = #tpu.dot_dimension_numbers<[1], [0], [0], [1], [0, 0, 1, 1], [], []>} : vector<8x8xf32>, vector<8x8xf32>, vector<8x8xf32> -> vector<8x8xf32>
    %308 = vector.extract_strided_slice %266 {offsets = [0, 16], sizes = [8, 8], strides = [1, 1]} : vector<8x32xf32> to vector<8x8xf32>
    %309 = vector.extract_strided_slice %269 {offsets = [16, 0], sizes = [8, 8], strides = [1, 1]} : vector<32x8xf32> to vector<8x8xf32>
    %cst_104 = arith.constant dense<0.000000e+00> : vector<8x8xf32>
    %310 = tpu.matmul %308, %309, %cst_104 {dimension_numbers = #tpu.dot_dimension_numbers<[1], [0], [0], [1], [0, 0, 1, 1], [], []>} : vector<8x8xf32>, vector<8x8xf32>, vector<8x8xf32> -> vector<8x8xf32>
    %cst_105 = arith.constant 0.353553385 : f32
    %311 = vector.broadcast %cst_105 : f32 to vector<8x8xf32>
    %312 = arith.mulf %310, %311 : vector<8x8xf32>
    %313 = arith.addf %312, %271 : vector<8x8xf32>
    %cst_106 = arith.constant dense<0xFF800000> : vector<8xf32>
    %314 = vector.multi_reduction <maximumf>, %313, %cst_106 [1] : vector<8x8xf32> to vector<8xf32>
    %315 = vector.shape_cast %314 : vector<8xf32> to vector<8x1xf32>
    %316 = vector.broadcast %315 : vector<8x1xf32> to vector<8x8xf32>
    %317 = arith.subf %313, %316 : vector<8x8xf32>
    %318 = math.exp %317 : vector<8x8xf32>
    %cst_107 = arith.constant dense<0.000000e+00> : vector<8xf32>
    %319 = vector.multi_reduction <add>, %318, %cst_107 [1] : vector<8x8xf32> to vector<8xf32>
    %320 = vector.shape_cast %319 : vector<8xf32> to vector<8x1xf32>
    %321 = tpu.reciprocal %320 : vector<8x1xf32> -> vector<8x1xf32>
    %322 = vector.broadcast %321 : vector<8x1xf32> to vector<8x8xf32>
    %323 = arith.mulf %318, %322 : vector<8x8xf32>
    %324 = vector.extract_strided_slice %267 {offsets = [0, 16], sizes = [8, 8], strides = [1, 1]} : vector<8x32xf32> to vector<8x8xf32>
    %cst_108 = arith.constant dense<0.000000e+00> : vector<8x8xf32>
    %325 = tpu.matmul %323, %324, %cst_108 {dimension_numbers = #tpu.dot_dimension_numbers<[1], [0], [0], [1], [0, 0, 1, 1], [], []>} : vector<8x8xf32>, vector<8x8xf32>, vector<8x8xf32> -> vector<8x8xf32>
    %326 = vector.extract_strided_slice %266 {offsets = [0, 24], sizes = [8, 8], strides = [1, 1]} : vector<8x32xf32> to vector<8x8xf32>
    %327 = vector.extract_strided_slice %269 {offsets = [24, 0], sizes = [8, 8], strides = [1, 1]} : vector<32x8xf32> to vector<8x8xf32>
    %cst_109 = arith.constant dense<0.000000e+00> : vector<8x8xf32>
    %328 = tpu.matmul %326, %327, %cst_109 {dimension_numbers = #tpu.dot_dimension_numbers<[1], [0], [0], [1], [0, 0, 1, 1], [], []>} : vector<8x8xf32>, vector<8x8xf32>, vector<8x8xf32> -> vector<8x8xf32>
    %cst_110 = arith.constant 0.353553385 : f32
    %329 = vector.broadcast %cst_110 : f32 to vector<8x8xf32>
    %330 = arith.mulf %328, %329 : vector<8x8xf32>
    %331 = arith.addf %330, %271 : vector<8x8xf32>
    %cst_111 = arith.constant dense<0xFF800000> : vector<8xf32>
    %332 = vector.multi_reduction <maximumf>, %331, %cst_111 [1] : vector<8x8xf32> to vector<8xf32>
    %333 = vector.shape_cast %332 : vector<8xf32> to vector<8x1xf32>
    %334 = vector.broadcast %333 : vector<8x1xf32> to vector<8x8xf32>
    %335 = arith.subf %331, %334 : vector<8x8xf32>
    %336 = math.exp %335 : vector<8x8xf32>
    %cst_112 = arith.constant dense<0.000000e+00> : vector<8xf32>
    %337 = vector.multi_reduction <add>, %336, %cst_112 [1] : vector<8x8xf32> to vector<8xf32>
    %338 = vector.shape_cast %337 : vector<8xf32> to vector<8x1xf32>
    %339 = tpu.reciprocal %338 : vector<8x1xf32> -> vector<8x1xf32>
    %340 = vector.broadcast %339 : vector<8x1xf32> to vector<8x8xf32>
    %341 = arith.mulf %336, %340 : vector<8x8xf32>
    %342 = vector.extract_strided_slice %267 {offsets = [0, 24], sizes = [8, 8], strides = [1, 1]} : vector<8x32xf32> to vector<8x8xf32>
    %cst_113 = arith.constant dense<0.000000e+00> : vector<8x8xf32>
    %343 = tpu.matmul %341, %342, %cst_113 {dimension_numbers = #tpu.dot_dimension_numbers<[1], [0], [0], [1], [0, 0, 1, 1], [], []>} : vector<8x8xf32>, vector<8x8xf32>, vector<8x8xf32> -> vector<8x8xf32>
    %344 = tpu.concatenate %289, %307, %325, %343 in 1 : vector<8x8xf32>, vector<8x8xf32>, vector<8x8xf32>, vector<8x8xf32> -> vector<8x32xf32>
    %345 = vector.extract_strided_slice %255 {offsets = [8, 0], sizes = [8, 32], strides = [1, 1]} : vector<16x32xf32> to vector<8x32xf32>
    %346 = vector.extract_strided_slice %265 {offsets = [8, 0], sizes = [8, 32], strides = [1, 1]} : vector<16x32xf32> to vector<8x32xf32>
    %347 = vector.extract_strided_slice %264 {offsets = [8, 0], sizes = [8, 32], strides = [1, 1]} : vector<16x32xf32> to vector<8x32xf32>
    %348 = tpu.transpose %347, [1, 0] : vector<8x32xf32> -> vector<32x8xf32>
    %349 = vector.extract_strided_slice %7 {offsets = [1, 0, 0], sizes = [1, 8, 8], strides = [1, 1, 1]} : vector<2x8x8xf32> to vector<1x8x8xf32>
    %350 = vector.shape_cast %349 : vector<1x8x8xf32> to vector<8x8xf32>
    %351 = vector.extract_strided_slice %345 {offsets = [0, 0], sizes = [8, 8], strides = [1, 1]} : vector<8x32xf32> to vector<8x8xf32>
    %352 = vector.extract_strided_slice %348 {offsets = [0, 0], sizes = [8, 8], strides = [1, 1]} : vector<32x8xf32> to vector<8x8xf32>
    %cst_114 = arith.constant dense<0.000000e+00> : vector<8x8xf32>
    %353 = tpu.matmul %351, %352, %cst_114 {dimension_numbers = #tpu.dot_dimension_numbers<[1], [0], [0], [1], [0, 0, 1, 1], [], []>} : vector<8x8xf32>, vector<8x8xf32>, vector<8x8xf32> -> vector<8x8xf32>
    %cst_115 = arith.constant 0.353553385 : f32
    %354 = vector.broadcast %cst_115 : f32 to vector<8x8xf32>
    %355 = arith.mulf %353, %354 : vector<8x8xf32>
    %356 = arith.addf %355, %350 : vector<8x8xf32>
    %cst_116 = arith.constant dense<0xFF800000> : vector<8xf32>
    %357 = vector.multi_reduction <maximumf>, %356, %cst_116 [1] : vector<8x8xf32> to vector<8xf32>
    %358 = vector.shape_cast %357 : vector<8xf32> to vector<8x1xf32>
    %359 = vector.broadcast %358 : vector<8x1xf32> to vector<8x8xf32>
    %360 = arith.subf %356, %359 : vector<8x8xf32>
    %361 = math.exp %360 : vector<8x8xf32>
    %cst_117 = arith.constant dense<0.000000e+00> : vector<8xf32>
    %362 = vector.multi_reduction <add>, %361, %cst_117 [1] : vector<8x8xf32> to vector<8xf32>
    %363 = vector.shape_cast %362 : vector<8xf32> to vector<8x1xf32>
    %364 = tpu.reciprocal %363 : vector<8x1xf32> -> vector<8x1xf32>
    %365 = vector.broadcast %364 : vector<8x1xf32> to vector<8x8xf32>
    %366 = arith.mulf %361, %365 : vector<8x8xf32>
    %367 = vector.extract_strided_slice %346 {offsets = [0, 0], sizes = [8, 8], strides = [1, 1]} : vector<8x32xf32> to vector<8x8xf32>
    %cst_118 = arith.constant dense<0.000000e+00> : vector<8x8xf32>
    %368 = tpu.matmul %366, %367, %cst_118 {dimension_numbers = #tpu.dot_dimension_numbers<[1], [0], [0], [1], [0, 0, 1, 1], [], []>} : vector<8x8xf32>, vector<8x8xf32>, vector<8x8xf32> -> vector<8x8xf32>
    %369 = vector.extract_strided_slice %345 {offsets = [0, 8], sizes = [8, 8], strides = [1, 1]} : vector<8x32xf32> to vector<8x8xf32>
    %370 = vector.extract_strided_slice %348 {offsets = [8, 0], sizes = [8, 8], strides = [1, 1]} : vector<32x8xf32> to vector<8x8xf32>
    %cst_119 = arith.constant dense<0.000000e+00> : vector<8x8xf32>
    %371 = tpu.matmul %369, %370, %cst_119 {dimension_numbers = #tpu.dot_dimension_numbers<[1], [0], [0], [1], [0, 0, 1, 1], [], []>} : vector<8x8xf32>, vector<8x8xf32>, vector<8x8xf32> -> vector<8x8xf32>
    %cst_120 = arith.constant 0.353553385 : f32
    %372 = vector.broadcast %cst_120 : f32 to vector<8x8xf32>
    %373 = arith.mulf %371, %372 : vector<8x8xf32>
    %374 = arith.addf %373, %350 : vector<8x8xf32>
    %cst_121 = arith.constant dense<0xFF800000> : vector<8xf32>
    %375 = vector.multi_reduction <maximumf>, %374, %cst_121 [1] : vector<8x8xf32> to vector<8xf32>
    %376 = vector.shape_cast %375 : vector<8xf32> to vector<8x1xf32>
    %377 = vector.broadcast %376 : vector<8x1xf32> to vector<8x8xf32>
    %378 = arith.subf %374, %377 : vector<8x8xf32>
    %379 = math.exp %378 : vector<8x8xf32>
    %cst_122 = arith.constant dense<0.000000e+00> : vector<8xf32>
    %380 = vector.multi_reduction <add>, %379, %cst_122 [1] : vector<8x8xf32> to vector<8xf32>
    %381 = vector.shape_cast %380 : vector<8xf32> to vector<8x1xf32>
    %382 = tpu.reciprocal %381 : vector<8x1xf32> -> vector<8x1xf32>
    %383 = vector.broadcast %382 : vector<8x1xf32> to vector<8x8xf32>
    %384 = arith.mulf %379, %383 : vector<8x8xf32>
    %385 = vector.extract_strided_slice %346 {offsets = [0, 8], sizes = [8, 8], strides = [1, 1]} : vector<8x32xf32> to vector<8x8xf32>
    %cst_123 = arith.constant dense<0.000000e+00> : vector<8x8xf32>
    %386 = tpu.matmul %384, %385, %cst_123 {dimension_numbers = #tpu.dot_dimension_numbers<[1], [0], [0], [1], [0, 0, 1, 1], [], []>} : vector<8x8xf32>, vector<8x8xf32>, vector<8x8xf32> -> vector<8x8xf32>
    %387 = vector.extract_strided_slice %345 {offsets = [0, 16], sizes = [8, 8], strides = [1, 1]} : vector<8x32xf32> to vector<8x8xf32>
    %388 = vector.extract_strided_slice %348 {offsets = [16, 0], sizes = [8, 8], strides = [1, 1]} : vector<32x8xf32> to vector<8x8xf32>
    %cst_124 = arith.constant dense<0.000000e+00> : vector<8x8xf32>
    %389 = tpu.matmul %387, %388, %cst_124 {dimension_numbers = #tpu.dot_dimension_numbers<[1], [0], [0], [1], [0, 0, 1, 1], [], []>} : vector<8x8xf32>, vector<8x8xf32>, vector<8x8xf32> -> vector<8x8xf32>
    %cst_125 = arith.constant 0.353553385 : f32
    %390 = vector.broadcast %cst_125 : f32 to vector<8x8xf32>
    %391 = arith.mulf %389, %390 : vector<8x8xf32>
    %392 = arith.addf %391, %350 : vector<8x8xf32>
    %cst_126 = arith.constant dense<0xFF800000> : vector<8xf32>
    %393 = vector.multi_reduction <maximumf>, %392, %cst_126 [1] : vector<8x8xf32> to vector<8xf32>
    %394 = vector.shape_cast %393 : vector<8xf32> to vector<8x1xf32>
    %395 = vector.broadcast %394 : vector<8x1xf32> to vector<8x8xf32>
    %396 = arith.subf %392, %395 : vector<8x8xf32>
    %397 = math.exp %396 : vector<8x8xf32>
    %cst_127 = arith.constant dense<0.000000e+00> : vector<8xf32>
    %398 = vector.multi_reduction <add>, %397, %cst_127 [1] : vector<8x8xf32> to vector<8xf32>
    %399 = vector.shape_cast %398 : vector<8xf32> to vector<8x1xf32>
    %400 = tpu.reciprocal %399 : vector<8x1xf32> -> vector<8x1xf32>
    %401 = vector.broadcast %400 : vector<8x1xf32> to vector<8x8xf32>
    %402 = arith.mulf %397, %401 : vector<8x8xf32>
    %403 = vector.extract_strided_slice %346 {offsets = [0, 16], sizes = [8, 8], strides = [1, 1]} : vector<8x32xf32> to vector<8x8xf32>
    %cst_128 = arith.constant dense<0.000000e+00> : vector<8x8xf32>
    %404 = tpu.matmul %402, %403, %cst_128 {dimension_numbers = #tpu.dot_dimension_numbers<[1], [0], [0], [1], [0, 0, 1, 1], [], []>} : vector<8x8xf32>, vector<8x8xf32>, vector<8x8xf32> -> vector<8x8xf32>
    %405 = vector.extract_strided_slice %345 {offsets = [0, 24], sizes = [8, 8], strides = [1, 1]} : vector<8x32xf32> to vector<8x8xf32>
    %406 = vector.extract_strided_slice %348 {offsets = [24, 0], sizes = [8, 8], strides = [1, 1]} : vector<32x8xf32> to vector<8x8xf32>
    %cst_129 = arith.constant dense<0.000000e+00> : vector<8x8xf32>
    %407 = tpu.matmul %405, %406, %cst_129 {dimension_numbers = #tpu.dot_dimension_numbers<[1], [0], [0], [1], [0, 0, 1, 1], [], []>} : vector<8x8xf32>, vector<8x8xf32>, vector<8x8xf32> -> vector<8x8xf32>
    %cst_130 = arith.constant 0.353553385 : f32
    %408 = vector.broadcast %cst_130 : f32 to vector<8x8xf32>
    %409 = arith.mulf %407, %408 : vector<8x8xf32>
    %410 = arith.addf %409, %350 : vector<8x8xf32>
    %cst_131 = arith.constant dense<0xFF800000> : vector<8xf32>
    %411 = vector.multi_reduction <maximumf>, %410, %cst_131 [1] : vector<8x8xf32> to vector<8xf32>
    %412 = vector.shape_cast %411 : vector<8xf32> to vector<8x1xf32>
    %413 = vector.broadcast %412 : vector<8x1xf32> to vector<8x8xf32>
    %414 = arith.subf %410, %413 : vector<8x8xf32>
    %415 = math.exp %414 : vector<8x8xf32>
    %cst_132 = arith.constant dense<0.000000e+00> : vector<8xf32>
    %416 = vector.multi_reduction <add>, %415, %cst_132 [1] : vector<8x8xf32> to vector<8xf32>
    %417 = vector.shape_cast %416 : vector<8xf32> to vector<8x1xf32>
    %418 = tpu.reciprocal %417 : vector<8x1xf32> -> vector<8x1xf32>
    %419 = vector.broadcast %418 : vector<8x1xf32> to vector<8x8xf32>
    %420 = arith.mulf %415, %419 : vector<8x8xf32>
    %421 = vector.extract_strided_slice %346 {offsets = [0, 24], sizes = [8, 8], strides = [1, 1]} : vector<8x32xf32> to vector<8x8xf32>
    %cst_133 = arith.constant dense<0.000000e+00> : vector<8x8xf32>
    %422 = tpu.matmul %420, %421, %cst_133 {dimension_numbers = #tpu.dot_dimension_numbers<[1], [0], [0], [1], [0, 0, 1, 1], [], []>} : vector<8x8xf32>, vector<8x8xf32>, vector<8x8xf32> -> vector<8x8xf32>
    %423 = tpu.concatenate %368, %386, %404, %422 in 1 : vector<8x8xf32>, vector<8x8xf32>, vector<8x8xf32>, vector<8x8xf32> -> vector<8x32xf32>
    %424 = tpu.concatenate %344, %423 in 0 : vector<8x32xf32>, vector<8x32xf32> -> vector<16x32xf32>
    %c1_134 = arith.constant 1 : index
    %c0_135 = arith.constant 0 : index
    %c0_136 = arith.constant 0 : index
    %425 = vector.load %arg9[%c1_134, %c0_135, %c0_136] : memref<2x32x32xf32, #tpu.memory_space<vmem>>, vector<1x32x32xf32>
    %426 = vector.shape_cast %425 : vector<1x32x32xf32> to vector<32x32xf32>
    %cst_137 = arith.constant dense<0.000000e+00> : vector<16x32xf32>
    %427 = tpu.matmul %424, %426, %cst_137 {dimension_numbers = #tpu.dot_dimension_numbers<[1], [0], [0], [1], [0, 0, 1, 1], [], []>} : vector<16x32xf32>, vector<32x32xf32>, vector<16x32xf32> -> vector<16x32xf32>
    %c1_138 = arith.constant 1 : index
    %c0_139 = arith.constant 0 : index
    %428 = vector.load %arg10[%c1_138, %c0_139] : memref<2x32xf32, #tpu.memory_space<vmem>>, vector<1x32xf32>
    %429 = vector.shape_cast %428 : vector<1x32xf32> to vector<32xf32>
    %430 = vector.shape_cast %429 : vector<32xf32> to vector<1x32xf32>
    %431 = vector.broadcast %430 : vector<1x32xf32> to vector<16x32xf32>
    %432 = arith.addf %427, %431 : vector<16x32xf32>
    %433 = arith.addf %220, %432 : vector<16x32xf32>
    %c0_140 = arith.constant 0 : index
    %c0_141 = arith.constant 0 : index
    %434 = vector.load %arg11[%c0_140, %c0_141] : memref<1x32xf32, #tpu.memory_space<vmem>>, vector<1x32xf32>
    %435 = vector.shape_cast %434 : vector<1x32xf32> to vector<32xf32>
    %c0_142 = arith.constant 0 : index
    %c0_143 = arith.constant 0 : index
    %436 = vector.load %arg12[%c0_142, %c0_143] : memref<1x32xf32, #tpu.memory_space<vmem>>, vector<1x32xf32>
    %437 = vector.shape_cast %436 : vector<1x32xf32> to vector<32xf32>
    %cst_144 = arith.constant dense<0.000000e+00> : vector<16xf32>
    %438 = vector.multi_reduction <add>, %433, %cst_144 [1] : vector<16x32xf32> to vector<16xf32>
    %439 = vector.shape_cast %438 : vector<16xf32> to vector<16x1xf32>
    %cst_145 = arith.constant 3.200000e+01 : f32
    %440 = vector.broadcast %cst_145 : f32 to vector<16x1xf32>
    %441 = arith.divf %439, %440 : vector<16x1xf32>
    %442 = vector.broadcast %441 : vector<16x1xf32> to vector<16x32xf32>
    %443 = arith.subf %433, %442 : vector<16x32xf32>
    %444 = arith.mulf %443, %443 : vector<16x32xf32>
    %cst_146 = arith.constant dense<0.000000e+00> : vector<16xf32>
    %445 = vector.multi_reduction <add>, %444, %cst_146 [1] : vector<16x32xf32> to vector<16xf32>
    %446 = vector.shape_cast %445 : vector<16xf32> to vector<16x1xf32>
    %cst_147 = arith.constant 3.100000e+01 : f32
    %447 = vector.broadcast %cst_147 : f32 to vector<16x1xf32>
    %448 = arith.divf %446, %447 : vector<16x1xf32>
    %449 = math.sqrt %448 : vector<16x1xf32>
    %cst_148 = arith.constant 9.99999997E-7 : f32
    %450 = vector.broadcast %cst_148 : f32 to vector<16x1xf32>
    %451 = arith.addf %449, %450 : vector<16x1xf32>
    %452 = tpu.reciprocal %451 : vector<16x1xf32> -> vector<16x1xf32>
    %453 = vector.broadcast %452 : vector<16x1xf32> to vector<16x32xf32>
    %454 = arith.mulf %443, %453 : vector<16x32xf32>
    %455 = vector.shape_cast %435 : vector<32xf32> to vector<1x32xf32>
    %456 = vector.broadcast %455 : vector<1x32xf32> to vector<16x32xf32>
    %457 = arith.mulf %456, %454 : vector<16x32xf32>
    %458 = vector.shape_cast %437 : vector<32xf32> to vector<1x32xf32>
    %459 = vector.broadcast %458 : vector<1x32xf32> to vector<16x32xf32>
    %460 = arith.addf %457, %459 : vector<16x32xf32>
    %461 = vector.shape_cast %460 : vector<16x32xf32> to vector<2x8x32xf32>
    %c0_149 = arith.constant 0 : index
    %c0_150 = arith.constant 0 : index
    %c0_151 = arith.constant 0 : index
    %462 = vector.load %arg13[%c0_149, %c0_150, %c0_151] : memref<2x8x32xf32, #tpu.memory_space<vmem>>, vector<2x8x32xf32>
    tpu.vector_store %arg13[%c0_149, %c0_150, %c0_151], %461 {strides = array<i32>} : memref<2x8x32xf32, #tpu.memory_space<vmem>>, vector<2x8x32xf32>,
    return
  }
  func.func @transform_0(%arg0: i32) -> (i32, i32, i32) {
    %c0_i32 = arith.constant 0 : i32
    %c0_i32_0 = arith.constant 0 : i32
    %c0_i32_1 = arith.constant 0 : i32
    return %arg0, %c0_i32, %c0_i32_0 : i32, i32, i32
  }
  func.func @transform_1(%arg0: i32) -> (i32, i32, i32) {
    %c0_i32 = arith.constant 0 : i32
    %c0_i32_0 = arith.constant 0 : i32
    %c0_i32_1 = arith.constant 0 : i32
    return %arg0, %c0_i32, %c0_i32_0 : i32, i32, i32
  }
  func.func @transform_2(%arg0: i32) -> (i32, i32) {
    %c0_i32 = arith.constant 0 : i32
    %c0_i32_0 = arith.constant 0 : i32
    %c0_i32_1 = arith.constant 0 : i32
    return %c0_i32, %c0_i32_0 : i32, i32
  }
  func.func @transform_3(%arg0: i32) -> (i32, i32) {
    %c0_i32 = arith.constant 0 : i32
    %c0_i32_0 = arith.constant 0 : i32
    %c0_i32_1 = arith.constant 0 : i32
    return %c0_i32, %c0_i32_0 : i32, i32
  }
  func.func @transform_4(%arg0: i32) -> (i32, i32, i32) {
    %c0_i32 = arith.constant 0 : i32
    %c0_i32_0 = arith.constant 0 : i32
    %c0_i32_1 = arith.constant 0 : i32
    %c0_i32_2 = arith.constant 0 : i32
    return %c0_i32, %c0_i32_0, %c0_i32_1 : i32, i32, i32
  }
  func.func @transform_5(%arg0: i32) -> (i32, i32) {
    %c0_i32 = arith.constant 0 : i32
    %c0_i32_0 = arith.constant 0 : i32
    %c0_i32_1 = arith.constant 0 : i32
    return %c0_i32, %c0_i32_0 : i32, i32
  }
  func.func @transform_6(%arg0: i32) -> (i32, i32, i32) {
    %c0_i32 = arith.constant 0 : i32
    %c0_i32_0 = arith.constant 0 : i32
    %c0_i32_1 = arith.constant 0 : i32
    %c0_i32_2 = arith.constant 0 : i32
    return %c0_i32, %c0_i32_0, %c0_i32_1 : i32, i32, i32
  }
  func.func @transform_7(%arg0: i32) -> (i32, i32) {
    %c0_i32 = arith.constant 0 : i32
    %c0_i32_0 = arith.constant 0 : i32
    %c0_i32_1 = arith.constant 0 : i32
    return %c0_i32, %c0_i32_0 : i32, i32
  }
  func.func @transform_8(%arg0: i32) -> (i32, i32, i32) {
    %c0_i32 = arith.constant 0 : i32
    %c0_i32_0 = arith.constant 0 : i32
    %c0_i32_1 = arith.constant 0 : i32
    %c0_i32_2 = arith.constant 0 : i32
    return %c0_i32, %c0_i32_0, %c0_i32_1 : i32, i32, i32
  }
  func.func @transform_9(%arg0: i32) -> (i32, i32) {
    %c0_i32 = arith.constant 0 : i32
    %c0_i32_0 = arith.constant 0 : i32
    %c0_i32_1 = arith.constant 0 : i32
    return %c0_i32, %c0_i32_0 : i32, i32
  }
  func.func @transform_10(%arg0: i32) -> (i32, i32) {
    %c0_i32 = arith.constant 0 : i32
    %c0_i32_0 = arith.constant 0 : i32
    %c0_i32_1 = arith.constant 0 : i32
    return %c0_i32, %c0_i32_0 : i32, i32
  }
  func.func @transform_11(%arg0: i32) -> (i32, i32) {
    %c0_i32 = arith.constant 0 : i32
    %c0_i32_0 = arith.constant 0 : i32
    %c0_i32_1 = arith.constant 0 : i32
    return %c0_i32, %c0_i32_0 : i32, i32
  }
  func.func @transform_12(%arg0: i32) -> (i32, i32, i32) {
    %c0_i32 = arith.constant 0 : i32
    %c0_i32_0 = arith.constant 0 : i32
    %c0_i32_1 = arith.constant 0 : i32
    return %arg0, %c0_i32, %c0_i32_0 : i32, i32, i32
  }
}

</mosaic_0001>

<bundles_post_ra>
// kernel: tpu_custom_call.1
= control target key start
LH: loop header
LB: loop body
LE: loop exit
PB: predicated region body
PF: predicated region fallthrough
CT: control target
= control target key end

     0   :  { %17 = vsyncpa [#allocation3], 0  ;;  %s2903_s0 = inlined_call_operand.hbm [shape: f32[2,8,32], index: 0, kind: input, shape index: {}]   ;;  %s2904_s1 = inlined_call_operand.hbm [shape: f32[2,8,8], index: 1, kind: input, shape index: {}]   ;;  %s2905_s2 = inlined_call_operand.hbm [shape: f32[2,32], index: 2, kind: input, shape index: {}]   ;;  %s2906_s3 = inlined_call_operand.vmem [shape: f32[2,32], index: 3, kind: input, shape index: {}]   ;;  %s2907_s4 = inlined_call_operand.hbm [shape: f32[2,32,32], index: 4, kind: input, shape index: {}]   ;;  %s2908_s5 = inlined_call_operand.vmem [shape: f32[2,32], index: 5, kind: input, shape index: {}]   ;;  %s2909_s6 = inlined_call_operand.hbm [shape: f32[2,32,64], index: 6, kind: input, shape index: {}]   ;;  %s2910_s7 = inlined_call_operand.vmem [shape: f32[2,64], index: 7, kind: input, shape index: {}]   ;;  %s2911_s8 = inlined_call_operand.hbm [shape: f32[2,32,32], index: 8, kind: input, shape index: {}]   ;;  %s2912_s9 = inlined_call_operand.vmem [shape: f32[2,32], index: 9, kind: input, shape index: {}]   ;;  %s2913_s10 = inlined_call_operand.vmem [shape: f32[1,32], index: 10, kind: input, shape index: {}]   ;;  %s2914_s11 = inlined_call_operand.vmem [shape: f32[1,32], index: 11, kind: input, shape index: {}]   ;;  %s2915_s12 = inlined_call_operand.hbm [shape: f32[2,8,32], index: 12, kind: output, shape index: {}]  }
   0x1   :  { %18 = vsyncpa [#allocation6], 0 }
   0x2   :  { %19 = vsyncpa [#allocation9], 0 }
   0x3   :  { %20 = vsyncpa [#allocation12], 0 }
   0x4   :  { %21 = vsyncpa [#allocation4], 0  ;;  %s39_s23 = sshll.u32 %s2904_s1, 4  ;;  %s2358_s24 = smov [#allocation5]   ;;  %s40_s23 = int_to_ptr.hbm [resolvable:$true] %s39_s23 }
   0x5   :  { %s41_s25 = sshll.u32 %s2358_s24, 4  ;;  %s65_s28 = sshll.u32 %s2907_s4, 4  ;;  %s42_s25 = int_to_ptr.vmem [resolvable:$true] %s41_s25  ;;  %s66_s28 = int_to_ptr.hbm [resolvable:$true] %s65_s28 }
   0x6   :  { %s2359_s29 = smov 128   ;;  %s2360_s30 = smov 8  }
   0x7   :  { %47 = dma.hbm_to_vmem [thread:$0]  %s40_s23, 256, %s42_s25, [#allocation6], %s2359_s29, %s2359_s29, %s2360_s30  }
   0x8   :  { %s2361_s13 = smov [#allocation8]   ;;  %s26_s1 = sshll.u32 %s2903_s0, 4  ;;  %s27_s1 = int_to_ptr.hbm [resolvable:$true] %s26_s1 }
   0x9   :  { %s67_s14 = sshll.u32 %s2361_s13, 4  ;;  %s53_s18 = sshll.u32 %s2905_s2, 4  ;;  %s68_s14 = int_to_ptr.vmem [resolvable:$true] %s67_s14  ;;  %s54_s18 = int_to_ptr.hbm [resolvable:$true] %s53_s18 }
   0xa   :  { %73 = dma.hbm_to_vmem [thread:$0]  %s66_s28, 1024, %s68_s14, [#allocation9], %s2359_s29, %s2359_s29, %s2360_s30  }
   0xb   :  { %s2362_s19 = smov [#allocation2]   ;;  %s2363_s21 = smov [#allocation7]  }
   0xc   :  { %s28_s20 = sshll.u32 %s2362_s19, 4  ;;  %s55_s0 = sshll.u32 %s2363_s21, 4  ;;  %s29_s20 = int_to_ptr.vmem [resolvable:$true] %s28_s20  ;;  %s56_s0 = int_to_ptr.vmem [resolvable:$true] %s55_s0 }
   0xd   :  { %34 = dma.hbm_to_vmem [thread:$0]  %s27_s1, 256, %s29_s20, [#allocation3], %s2359_s29, %s2359_s29, %s2360_s30  }
   0xe   :  { %s80_s24 = sshll.u32 %s2909_s6, 4  ;;  %s95_s2 = sshll.u32 %s2911_s8, 4  ;;  %s81_s24 = int_to_ptr.hbm [resolvable:$true] %s80_s24  ;;  %s96_s2 = int_to_ptr.hbm [resolvable:$true] %s95_s2 }
   0xf   :  { %58 = dma.hbm_to_vmem [thread:$0]  %s54_s18, 32, %s56_s0, [#allocation6]  }
  0x10   :  { %s2364_s27 = smov [#allocation10]   ;;  %s2365_s13 = smov [#allocation11]  }
  0x11   :  { %s82_s28 = sshll.u32 %s2364_s27, 4  ;;  %s97_s14 = sshll.u32 %s2365_s13, 4  ;;  %s83_s28 = int_to_ptr.vmem [resolvable:$true] %s82_s28  ;;  %s98_s14 = int_to_ptr.vmem [resolvable:$true] %s97_s14 }
  0x12   :  { %88 = dma.hbm_to_vmem [thread:$0]  %s81_s24, 1024, %s83_s28, [#allocation9], %s2359_s29, %s2359_s29, %s2360_s30  }
  0x13   :  { %103 = dma.hbm_to_vmem [thread:$0]  %s96_s2, 1024, %s98_s14, [#allocation12], %s2359_s29, %s2359_s29, %s2360_s30  }
  0x14   :  { %2348 = dma.done.wait [#allocation3], 256  }
  0x15   :  { %2349 = vsyncadd [#allocation3], 4294967040 }
  0x16   :  { %2350 = dma.done.wait [#allocation6], 288  }
  0x17   :  { %2351 = vsyncadd [#allocation6], 4294967008 }
  0x18   :  { %2352 = dma.done.wait [#allocation9], 2048  }
  0x19   :  { %2353 = vsyncadd [#allocation9], 4294965248 }
  0x1a   :  { %2354 = dma.done.wait [#allocation12], 1024  }
  0x1b   :  { %2355 = vsyncadd [#allocation12], 4294966272  ;;  %vm144_vm0 = vcmask 261120   ;;  %v2477_v0 = vld [vmem:[#allocation2 + $0x8] sm:$0xff]  ;;  %v2481_v2 = vld [vmem:[#allocation2] sm:$0xff]  ;;  %v2366_v4 = vmov 32.0  }
  0x1c   :  { %v148_v1 = vsel %vm144_vm0, %v2477_v0, 0.0  ;;  %v145_v3 = vsel %vm144_vm0, %v2481_v2, 0.0  ;;  %2086 = vrcp.f32 %v2366_v4  ;;  %v2367_v21 = vmov 31.0   ;;  %v244_v28 = vld [vmem:[#allocation8 + $0x18] sm:$0xff]  ;;  %v243_v29 = vld [vmem:[#allocation8 + $0x10] sm:$0xff]  ;;  %v242_v31 = vld [vmem:[#allocation8 + $0x8] sm:$0xff] }
  0x1d   :  { %149 = vadd.xlane.f32.xlu0 %v148_v1  ;;  %2088 = vrcp.f32 %v2367_v21  ;;  %2049 = vmatpush.msra.mxu1 %v244_v28  ;;  %v241_v33 = vld [vmem:[#allocation8] sm:$0xff]  ;;  %v279_v42 = vld [vmem:[#allocation10 + $0x18] sm:$0xff]  ;;  %v278_v43 = vld [vmem:[#allocation10 + $0x10] sm:$0xff]  ;;  %vm311_vm15 = vcmask 64512   ;;  %s2368_s17 = smov 96   ;;  %s2369_s18 = smov 120  }
  0x1e   :  { %265 = vmatpush.msra.mxu0 %v244_v28  ;;  %v277_v46 = vld [vmem:[#allocation10 + $0x8] sm:$0xff]  ;;  %v276_v50 = vld [vmem:[#allocation10] sm:$0xff]  ;;  %s2370_s19 = smov 112   ;;  %s2371_s20 = smov 104  }
  0x1f   :  { %2050 = vmatpush.msra.mxu1 %v243_v29  ;;  %s2373_s21 = smov 88   ;;  %s2374_s0 = smov 72  }
  0x20   :  { %266 = vmatpush.msra.mxu0 %v243_v29  ;;  %s2375_s22 = smov 80   ;;  %s2376_s23 = smov 24  }
  0x21   :  { %2051 = vmatpush.msra.mxu1 %v242_v31  ;;  %s2377_s24 = smov 16   ;;  %s1973_s4 = sshll.u32 %s2915_s12, 4  ;;  %s1974_s4 = int_to_ptr.hbm [resolvable:$true] %s1973_s4 }
  0x22   :  { %v2087_v5 = vpop.eup %2086  ;;  %267 = vmatpush.msra.mxu0 %v242_v31 }
  0x23   :  { %v152_v6 = vmul.f32 32.0, %v2087_v5  ;;  %vm156_vm1 = vweird.f32 %v2087_v5  ;;  %v2089_v22 = vpop.eup %2088  ;;  %2052 = vmatpush.msra.mxu1 %v241_v33 }
  0x24   :  { %v171_v23 = vmul.f32 31.0, %v2089_v22  ;;  %vm175_vm2 = vweird.f32 %v2089_v22  ;;  %268 = vmatpush.msra.mxu0 %v241_v33 }
  0x25   :  { %146 = vadd.xlane.f32.xlu0 %v145_v3  ;;  %v153_v7 = vsub.f32 1.0, %v152_v6  ;;  %300 = vmatpush.msrb.mxu1 %v279_v42  ;;  %v136_v42 = vld [vmem:[#allocation5] sm:$0xff] }
  0x26   :  { %v172_v24 = vsub.f32 1.0, %v171_v23 }
  0x27   :  { %v154_v8 = vmul.f32 %v2087_v5, %v153_v7  ;;  %301 = vmatpush.msrb.mxu1 %v278_v43 }
  0x28   :  { %v173_v25 = vmul.f32 %v2089_v22, %v172_v24 }
  0x29   :  { %v155_v9 = vadd.f32 %v2087_v5, %v154_v8  ;;  %302 = vmatpush.msrb.mxu1 %v277_v46 }
  0x2a   :  { %v174_v26 = vadd.f32 %v2089_v22, %v173_v25 }
  0x2b   :  { %v2485_v10 = vsel %vm156_vm1, %v2087_v5, %v155_v9  ;;  %303 = vmatpush.msrb.mxu1 %v276_v50  ;;  %vm138_vm1 = vcmp.eq.f32.partialorder %v136_v42, 0.0 }
  0x2c   :  { %v2501_v27 = vsel %vm175_vm2, %v2089_v22, %v174_v26 }
  0x90   :  { %v150_v11 = vpop.xlane.xlu0 %149 }
  0x91   :  { %v159_v12 = vmul.f32 %v2485_v10, %v150_v11  ;;  %v2074_v11 = vld [vmem:[#allocation7] ss:$0 sm:$0xff] }
  0x93   :  { %v2489_v13 = vsub.f32 %v2477_v0, %v159_v12 }
  0x95   :  { %v163_v14 = vmul.f32 %v2489_v13, %v2489_v13 }
  0x97   :  { %v167_v15 = vsel %vm144_vm0, %v163_v14, 0.0 }
  0x98   :  { %168 = vadd.xlane.f32.xlu1 %v167_v15  ;;  %v147_v16 = vpop.xlane.xlu0 %146 }
  0x99   :  { %v158_v17 = vmul.f32 %v2485_v10, %v147_v16  ;;  %v2075_v16 = vld [vmem:[%s2906_s3] ss:$0 sm:$0xff] }
  0x9b   :  { %v2496_v18 = vsub.f32 %v2481_v2, %v158_v17 }
  0x9d   :  { %v162_v19 = vmul.f32 %v2496_v18, %v2496_v18 }
  0x9f   :  { %v164_v20 = vsel %vm144_vm0, %v162_v19, 0.0 }
  0xa0   :  { %165 = vadd.xlane.f32.xlu1 %v164_v20 }
 0x10b   :  { %v169_v30 = vpop.xlane.xlu1 %168 }
 0x10c   :  { %v178_v32 = vmul.f32 %v2501_v27, %v169_v30 }
 0x10e   :  { %2090 = vrsqrt.f32 %v178_v32  ;;  %vm198_vm3 = vcmp.eq.f32.partialorder %v178_v32, inf  ;;  %v201_v49 = vand.u32 2147483648, %v178_v32  ;;  %vm200_vm4 = vcmp.eq.f32.partialorder %v178_v32, 0.0 }
 0x113   :  { %v166_v34 = vpop.xlane.xlu1 %165 }
 0x114   :  { %v2091_v35 = vpop.eup %2090  ;;  %v177_v36 = vmul.f32 %v2501_v27, %v166_v34 }
 0x115   :  { %v192_v37 = vmul.f32 %v2091_v35, %v178_v32 }
 0x116   :  { %2092 = vrsqrt.f32 %v177_v36  ;;  %vm186_vm5 = vcmp.eq.f32.partialorder %v177_v36, inf  ;;  %v189_v58 = vand.u32 2147483648, %v177_v36  ;;  %vm188_vm6 = vcmp.eq.f32.partialorder %v177_v36, 0.0 }
 0x117   :  { %v193_v38 = vmul.f32 %v2091_v35, %v192_v37 }
 0x119   :  { %v194_v39 = vmul.f32 0.5, %v193_v38 }
 0x11b   :  { %v195_v40 = vsub.f32 1.5, %v194_v39 }
 0x11c   :  { %v2093_v41 = vpop.eup %2092 }
 0x11d   :  { %v196_v44 = vmul.f32 %v2091_v35, %v195_v40  ;;  %v180_v45 = vmul.f32 %v2093_v41, %v177_v36 }
 0x11f   :  { %v197_v47 = vmul.f32 %v196_v44, %v178_v32  ;;  %v181_v48 = vmul.f32 %v2093_v41, %v180_v45  ;;  %v2372_v45 = vmov 0.0  }
 0x120   :  { %v2552_v46 = vsel %vm138_vm1, -1e+09, %v2372_v45 }
 0x121   :  { %v199_v51 = vsel %vm198_vm3, %v178_v32, %v197_v47  ;;  %v182_v52 = vmul.f32 0.5, %v181_v48  ;;  %v2077_v32 = vld [vmem:[%s2910_s7] ss:$0 sm:$0xff] }
 0x122   :  { %v202_v53 = vsel %vm200_vm4, %v201_v49, %v199_v51 }
 0x123   :  { %v183_v54 = vsub.f32 1.5, %v182_v52  ;;  %v204_v55 = vadd.f32 1e-06, %v202_v53 }
 0x125   :  { %v184_v56 = vmul.f32 %v2093_v41, %v183_v54  ;;  %2094 = vrcp.f32 %v204_v55  ;;  %v230_v3 = vand.u32 2147483648, %v204_v55  ;;  %v228_v5 = vand.u32 2147483647, %v204_v55 }
 0x126   :  { %vm224_vm8 = vweird.f32 %v204_v55 }
 0x127   :  { %v185_v57 = vmul.f32 %v184_v56, %v177_v36  ;;  %v231_v8 = vor.u32 1.1754944e-38, %v230_v3  ;;  %vm229_vm10 = vcmp.eq.f32.partialorder %v228_v5, 8.507059e+37 }
 0x129   :  { %v187_v59 = vsel %vm186_vm5, %v177_v36, %v185_v57 }
 0x12a   :  { %v190_v60 = vsel %vm188_vm6, %v189_v58, %v187_v59 }
 0x12b   :  { %v2095_v61 = vpop.eup %2094  ;;  %v203_v62 = vadd.f32 1e-06, %v190_v60 }
 0x12c   :  { %v220_v63 = vmul.f32 %v2095_v61, %v204_v55  ;;  %vm225_vm7 = vweird.f32 %v2095_v61 }
 0x12d   :  { %2096 = vrcp.f32 %v203_v62  ;;  %vm226_vm9 = vmor %vm224_vm8, %vm225_vm7  ;;  %v216_v19 = vand.u32 2147483648, %v203_v62  ;;  %v214_v22 = vand.u32 2147483647, %v203_v62  ;;  %vm210_vm12 = vweird.f32 %v203_v62 }
 0x12e   :  { %v221_v1 = vsub.f32 1.0, %v220_v63 }
 0x12f   :  { %v217_v25 = vor.u32 1.1754944e-38, %v216_v19  ;;  %vm215_vm14 = vcmp.eq.f32.partialorder %v214_v22, 8.507059e+37 }
 0x130   :  { %v222_v4 = vmul.f32 %v2095_v61, %v221_v1 }
 0x132   :  { %v223_v6 = vadd.f32 %v2095_v61, %v222_v4 }
 0x133   :  { %v2097_v7 = vpop.eup %2096 }
 0x134   :  { %v227_v9 = vsel %vm226_vm9, %v2095_v61, %v223_v6  ;;  %v206_v12 = vmul.f32 %v2097_v7, %v203_v62  ;;  %vm211_vm11 = vweird.f32 %v2097_v7 }
 0x135   :  { %v232_v14 = vsel %vm229_vm10, %v231_v8, %v227_v9  ;;  %vm212_vm13 = vmor %vm210_vm12, %vm211_vm11 }
 0x136   :  { %v234_v15 = vmul.f32 %v232_v14, %v2489_v13  ;;  %v207_v17 = vsub.f32 1.0, %v206_v12 }
 0x138   :  { %v237_v20 = vmul.f32 %v2074_v11, %v234_v15  ;;  %v208_v21 = vmul.f32 %v2097_v7, %v207_v17 }
 0x13a   :  { %v240_v23 = vadd.f32 %v2075_v16, %v237_v20  ;;  %v209_v24 = vadd.f32 %v2097_v7, %v208_v21 }
 0x13c   :  { %1990 = vmatmul.msk.f32.vlgmr.msra.gmra.mxu1 %vm144_vm0, %v240_v23  ;;  %v213_v26 = vsel %vm212_vm13, %v2097_v7, %v209_v24 }
 0x13d   :  { %v218_v13 = vsel %vm215_vm14, %v217_v25, %v213_v26 }
 0x13e   :  { %v233_v28 = vmul.f32 %v218_v13, %v2496_v18  ;;  %v2076_v18 = vld [vmem:[%s2908_s5] ss:$0 sm:$0xff] }
 0x140   :  { %v236_v29 = vmul.f32 %v2074_v11, %v233_v28 }
 0x142   :  { %v239_v30 = vadd.f32 %v2075_v16, %v236_v29  ;;  %v137_v29 = vld [vmem:[#allocation5 + $0x8] sm:$0xff] }
 0x143   :  { %vm139_vm6 = vcmp.eq.f32.partialorder %v137_v29, 0.0 }
 0x144   :  { %1989 = vmatmul.msk.f32.vlgmr.msra.gmra.mxu0 %vm144_vm0, %v239_v30  ;;  %1991 = vmatmul.msk.f32.vlgmr.msrb.gmra.mxu1 %vm144_vm0, %v2481_v2 }
 0x14c   :  { %1992 = vmatmul.msk.f32.gmra.mxu1 %vm144_vm0, %v2477_v0 }
 0x1b9   :  { %v273_v31 = vpop.f32.mrf.mxu1 }
 0x1ba   :  { %v2535_v2 = vadd.f32 %v2076_v18, %v273_v31 }
 0x1c1   :  { %v305_v33 = vpop.f32.mrf.mxu1  ;;  %v270_v34 = vpop.f32.mrf.mxu0 }
 0x1c2   :  { %v2519_v35 = vadd.f32 %v2077_v32, %v305_v33  ;;  %v271_v0 = vadd.f32 %v2076_v18, %v270_v34  ;;  %v2591_v34 = vsel %vm139_vm6, -1e+09, %v2372_v45 }
 0x1c4   :  { %1993 = vmatpush.xpose.msk.msra.mxu2 %vm311_vm15, %v2519_v35  ;;  %364 = vrot.lane.b32.xlu0 %v2519_v35, %s2368_s17 }
 0x1c5   :  { %392 = vrot.lane.b32.xlu1 %v2519_v35, %s2369_s18 }
 0x1c7   :  { %1994 = vmatmul.msk.f32.vlgmr.msra.gmra.mxu2 %vm311_vm15, %v271_v0 }
 0x1c9   :  { %v308_v36 = vpop.f32.mrf.mxu1 }
 0x1ca   :  { %v2540_v37 = vadd.f32 %v2077_v32, %v308_v36 }
 0x1cc   :  { %472 = vrot.lane.b32.xlu0 %v2519_v35, %s2370_s19 }
 0x1cd   :  { %552 = vrot.lane.b32.xlu1 %v2519_v35, %s2371_s20 }
 0x1d4   :  { %550 = vrot.lane.b32.xlu0 %v271_v0, %s2371_s20 }
 0x1d5   :  { %805 = vrot.lane.b32.xlu1 %v2535_v2, %s2370_s19 }
 0x1dc   :  { %727 = vrot.lane.b32.xlu0 %v2540_v37, %s2369_s18 }
 0x1dd   :  { %887 = vrot.lane.b32.xlu1 %v2540_v37, %s2371_s20 }
 0x1e4   :  { %885 = vrot.lane.b32.xlu0 %v2535_v2, %s2371_s20 }
 0x236   :  { %v365_v38 = vpop.permute.xlu0 %364 }
 0x237   :  { %v393_v39 = vpop.permute.xlu1 %392  ;;  %385 = vmatpush.msra.mxu3 %v365_v38 }
 0x239   :  { %1996 = vmatpush.xpose.msk.msrb.mxu3 %vm311_vm15, %v393_v39 }
 0x23e   :  { %v473_v40 = vpop.permute.xlu0 %472 }
 0x23f   :  { %v553_v41 = vpop.permute.xlu1 %552 }
 0x240   :  { %2002 = vmatpush.xpose.msk.msrb.mxu0 %vm311_vm15, %v553_v41 }
 0x246   :  { %v551_v43 = vpop.permute.xlu0 %550 }
 0x247   :  { %2003 = vmatmul.msk.f32.vlgmr.msrb.gmra.mxu0 %vm311_vm15, %v551_v43  ;;  %v806_v60 = vpop.permute.xlu1 %805 }
 0x24a   :  { %v335_v44 = vpop.f32.mrf.mxu2 }
 0x24b   :  { %v338_v47 = vmul.f32 0.35355338, %v335_v44 }
 0x24d   :  { %v339_v48 = vadd.f32 %v338_v47, %v2552_v46 }
 0x24e   :  { %v728_v49 = vpop.permute.xlu0 %727 }
 0x24f   :  { %v340_v50 = vsel %vm311_vm15, %v339_v48, -inf  ;;  %2008 = vmatpush.xpose.msk.msra.mxu0 %vm311_vm15, %v728_v49  ;;  %v888_v63 = vpop.permute.xlu1 %887 }
 0x250   :  { %341 = vmax.xlane.f32.xlu2 %v340_v50 }
 0x253   :  { %2014 = vmatpush.xpose.msk.msrb.mxu0 %vm311_vm15, %v888_v63 }
 0x256   :  { %v886_v62 = vpop.permute.xlu0 %885 }
 0x268   :  { %390 = vrot.lane.b32.xlu2 %v271_v0, %s2369_s18 }
 0x2c3   :  { %v342_v51 = vpop.xlane.xlu2 %341 }
 0x2c4   :  { %v343_v52 = vsub.f32 %v339_v48, %v342_v51  ;;  %v575_v53 = vpop.f32.mrf.mxu0 }
 0x2c5   :  { %v578_v54 = vmul.f32 0.35355338, %v575_v53 }
 0x2c6   :  { %v344_v55 = vmul.f32 1.442695, %v343_v52 }
 0x2c7   :  { %v2559_v56 = vadd.f32 %v578_v54, %v2552_v46 }
 0x2c8   :  { %2098 = vpow2.f32 %v344_v55 }
 0x2c9   :  { %v580_v57 = vsel %vm311_vm15, %v2559_v56, -inf }
 0x2ca   :  { %581 = vmax.xlane.f32.xlu0 %v580_v57 }
 0x2cb   :  { %v391_v61 = vpop.permute.xlu2 %390 }
 0x2ce   :  { %v2099_v58 = vpop.eup %2098 }
 0x2cf   :  { %v346_v59 = vsel %vm311_vm15, %v2099_v58, 0.0 }
 0x2d0   :  { %347 = vadd.xlane.f32.xlu2 %v346_v59 }
 0x2de   :  { %444 = vrot.lane.b32.xlu0 %v2519_v35, %s2373_s21 }
 0x2e8   :  { %470 = vrot.lane.b32.xlu2 %v271_v0, %s2370_s19 }
 0x2f0   :  { %807 = vrot.lane.b32.xlu2 %v2540_v37, %s2370_s19 }
 0x2f8   :  { %725 = vrot.lane.b32.xlu2 %v2535_v2, %s2369_s18 }
 0x33d   :  { %v582_v3 = vpop.xlane.xlu0 %581 }
 0x33e   :  { %v583_v39 = vsub.f32 %v2559_v56, %v582_v3 }
 0x340   :  { %v584_v43 = vmul.f32 1.442695, %v583_v39 }
 0x343   :  { %v348_v1 = vpop.xlane.xlu2 %347 }
 0x344   :  { %2100 = vrcp.f32 %v348_v1  ;;  %v360_v8 = vand.u32 2147483648, %v348_v1  ;;  %v358_v11 = vand.u32 2147483647, %v348_v1  ;;  %vm354_vm3 = vweird.f32 %v348_v1 }
 0x345   :  { %2102 = vpow2.f32 %v584_v43 }
 0x346   :  { %v361_v15 = vor.u32 1.1754944e-38, %v360_v8  ;;  %vm359_vm5 = vcmp.eq.f32.partialorder %v358_v11, 8.507059e+37 }
 0x34a   :  { %v2101_v4 = vpop.eup %2100 }
 0x34b   :  { %v350_v5 = vmul.f32 %v2101_v4, %v348_v1  ;;  %v471_v6 = vpop.permute.xlu2 %470  ;;  %vm355_vm2 = vweird.f32 %v2101_v4  ;;  %v2103_v51 = vpop.eup %2102 }
 0x34c   :  { %vm356_vm4 = vmor %vm354_vm3, %vm355_vm2  ;;  %v586_v52 = vsel %vm311_vm15, %v2103_v51, 0.0 }
 0x34d   :  { %v351_v7 = vsub.f32 1.0, %v350_v5 }
 0x34f   :  { %v352_v9 = vmul.f32 %v2101_v4, %v351_v7 }
 0x350   :  { %v445_v12 = vpop.permute.xlu0 %444 }
 0x351   :  { %465 = vmatpush.msrb.mxu2 %v445_v12  ;;  %v353_v14 = vadd.f32 %v2101_v4, %v352_v9 }
 0x353   :  { %v808_v16 = vpop.permute.xlu2 %807  ;;  %v357_v17 = vsel %vm356_vm4, %v2101_v4, %v353_v14 }
 0x354   :  { %v362_v19 = vsel %vm359_vm5, %v361_v15, %v357_v17 }
 0x355   :  { %v363_v20 = vmul.f32 %v2099_v58, %v362_v19 }
 0x357   :  { %1995 = vmatmul.msk.f32.vlgmr.msra.gmra.mxu3 %vm311_vm15, %v363_v20 }
 0x358   :  { %1999 = vmatpush.xpose.msk.msra.mxu3 %vm311_vm15, %v473_v40 }
 0x35b   :  { %v726_v21 = vpop.permute.xlu2 %725 }
 0x35c   :  { %2009 = vmatmul.msk.f32.vlgmr.msra.gmra.mxu0 %vm311_vm15, %v726_v21 }
 0x35f   :  { %1997 = vmatmul.msk.f32.vlgmr.msrb.gmra.mxu3 %vm311_vm15, %v391_v61 }
 0x360   :  { %2005 = vmatpush.xpose.msk.msrb.mxu3 %vm311_vm15, %v2540_v37 }
 0x364   :  { %2015 = vmatmul.msk.f32.vlgmr.msrb.gmra.mxu0 %vm311_vm15, %v886_v62 }
 0x367   :  { %2000 = vmatmul.msk.f32.vlgmr.msra.gmra.mxu3 %vm311_vm15, %v471_v6 }
 0x368   :  { %2011 = vmatpush.xpose.msk.msra.mxu3 %vm311_vm15, %v808_v16 }
 0x36f   :  { %2006 = vmatmul.msk.f32.vlgmr.msrb.gmra.mxu3 %vm311_vm15, %v2535_v2 }
 0x377   :  { %2012 = vmatmul.msk.f32.vlgmr.msra.gmra.mxu3 %vm311_vm15, %v806_v60 }
 0x3d9   :  { %v750_v13 = vpop.f32.mrf.mxu0 }
 0x3da   :  { %v2584_v22 = vpop.f32.mrf.mxu3  ;;  %v753_v32 = vmul.f32 0.35355338, %v750_v13 }
 0x3dc   :  { %v754_v2 = vadd.f32 %v753_v32, %v2591_v34 }
 0x3de   :  { %v755_v42 = vsel %vm311_vm15, %v754_v2, -inf }
 0x3e1   :  { %v910_v36 = vpop.f32.mrf.mxu0 }
 0x3e2   :  { %v415_v23 = vpop.f32.mrf.mxu3  ;;  %v913_v40 = vmul.f32 0.35355338, %v910_v36 }
 0x3e3   :  { %v418_v24 = vmul.f32 0.35355338, %v415_v23 }
 0x3e4   :  { %v914_v47 = vadd.f32 %v913_v40, %v2591_v34 }
 0x3e5   :  { %v419_v25 = vadd.f32 %v418_v24, %v2552_v46 }
 0x3e6   :  { %v915_v50 = vsel %vm311_vm15, %v914_v47, -inf }
 0x3e7   :  { %v420_v26 = vsel %vm311_vm15, %v419_v25, -inf }
 0x3e8   :  { %421 = vmax.xlane.f32.xlu2 %v420_v26 }
 0x3ea   :  { %v495_v28 = vpop.f32.mrf.mxu3 }
 0x3eb   :  { %v498_v30 = vmul.f32 0.35355338, %v495_v28 }
 0x3ed   :  { %v499_v31 = vadd.f32 %v498_v30, %v2552_v46 }
 0x3ef   :  { %v500_v33 = vsel %vm311_vm15, %v499_v31, -inf }
 0x3f0   :  { %501 = vmax.xlane.f32.xlu1 %v500_v33 }
 0x3f2   :  { %v670_v18 = vpop.f32.mrf.mxu3 }
 0x3f3   :  { %v673_v0 = vmul.f32 0.35355338, %v670_v18 }
 0x3f5   :  { %v674_v38 = vadd.f32 %v673_v0, %v2591_v34 }
 0x3f7   :  { %v675_v41 = vsel %vm311_vm15, %v674_v38, -inf }
 0x3f8   :  { %676 = vmax.xlane.f32.xlu2 %v675_v41  ;;  %756 = vmax.xlane.f32.xlu1 %v755_v42 }
 0x3fa   :  { %v830_v44 = vpop.f32.mrf.mxu3 }
 0x3fb   :  { %v833_v45 = vmul.f32 0.35355338, %v830_v44 }
 0x3fd   :  { %v834_v48 = vadd.f32 %v833_v45, %v2591_v34 }
 0x3ff   :  { %v835_v49 = vsel %vm311_vm15, %v834_v48, -inf }
 0x400   :  { %836 = vmax.xlane.f32.xlu0 %v835_v49  ;;  %916 = vmax.xlane.f32.xlu2 %v915_v50 }
 0x408   :  { %587 = vadd.xlane.f32.xlu2 %v586_v52 }
 0x414   :  { %604 = vrot.lane.b32.xlu0 %v2519_v35, %s2374_s0 }
 0x45b   :  { %v422_v53 = vpop.xlane.xlu2 %421 }
 0x45c   :  { %v423_v3 = vsub.f32 %v419_v25, %v422_v53 }
 0x45e   :  { %v424_v7 = vmul.f32 1.442695, %v423_v3 }
 0x463   :  { %v502_v54 = vpop.xlane.xlu1 %501 }
 0x464   :  { %v503_v55 = vsub.f32 %v499_v31, %v502_v54 }
 0x466   :  { %v504_v56 = vmul.f32 1.442695, %v503_v55 }
 0x468   :  { %2104 = vpow2.f32 %v504_v56 }
 0x46b   :  { %v677_v57 = vpop.xlane.xlu2 %676  ;;  %v757_v58 = vpop.xlane.xlu1 %756 }
 0x46c   :  { %v758_v59 = vsub.f32 %v754_v2, %v757_v58  ;;  %v678_v11 = vsub.f32 %v674_v38, %v677_v57 }
 0x46e   :  { %v2605_v60 = vpop.eup %2104  ;;  %v759_v61 = vmul.f32 1.442695, %v758_v59  ;;  %v679_v16 = vmul.f32 1.442695, %v678_v11 }
 0x46f   :  { %v506_v62 = vsel %vm311_vm15, %v2605_v60, 0.0 }
 0x470   :  { %507 = vadd.xlane.f32.xlu0 %v506_v62  ;;  %2106 = vpow2.f32 %v759_v61 }
 0x473   :  { %v917_v63 = vpop.xlane.xlu2 %916  ;;  %v837_v12 = vpop.xlane.xlu0 %836 }
 0x474   :  { %v918_v1 = vsub.f32 %v914_v47, %v917_v63  ;;  %v838_v21 = vsub.f32 %v834_v48, %v837_v12 }
 0x476   :  { %v919_v4 = vmul.f32 1.442695, %v918_v1  ;;  %v2609_v5 = vpop.eup %2106  ;;  %v839_v29 = vmul.f32 1.442695, %v838_v21 }
 0x477   :  { %v761_v6 = vsel %vm311_vm15, %v2609_v5, 0.0 }
 0x478   :  { %2108 = vpow2.f32 %v919_v4  ;;  %762 = vadd.xlane.f32.xlu2 %v761_v6 }
 0x47b   :  { %v588_v8 = vpop.xlane.xlu2 %587 }
 0x47c   :  { %2110 = vrcp.f32 %v588_v8  ;;  %v600_v23 = vand.u32 2147483648, %v588_v8  ;;  %v598_v26 = vand.u32 2147483647, %v588_v8  ;;  %vm594_vm8 = vweird.f32 %v588_v8 }
 0x47d   :  { %2112 = vpow2.f32 %v424_v7 }
 0x47e   :  { %v2613_v9 = vpop.eup %2108  ;;  %2114 = vpow2.f32 %v679_v16  ;;  %v601_v30 = vor.u32 1.1754944e-38, %v600_v23  ;;  %vm599_vm10 = vcmp.eq.f32.partialorder %v598_v26, 8.507059e+37 }
 0x47f   :  { %v921_v14 = vsel %vm311_vm15, %v2613_v9, 0.0  ;;  %2116 = vpow2.f32 %v839_v29 }
 0x480   :  { %922 = vadd.xlane.f32.xlu1 %v921_v14 }
 0x482   :  { %v2111_v15 = vpop.eup %2110 }
 0x483   :  { %v590_v17 = vmul.f32 %v2111_v15, %v588_v8  ;;  %v2617_v19 = vpop.eup %2112  ;;  %vm595_vm7 = vweird.f32 %v2111_v15 }
 0x484   :  { %779 = vrot.lane.b32.xlu0 %v2540_v37, %s2373_s21  ;;  %v426_v13 = vsel %vm311_vm15, %v2617_v19, 0.0  ;;  %vm596_vm9 = vmor %vm594_vm8, %vm595_vm7  ;;  %v2623_v32 = vpop.eup %2114 }
 0x485   :  { %v591_v20 = vsub.f32 1.0, %v590_v17  ;;  %v681_v0 = vsel %vm311_vm15, %v2623_v32, 0.0  ;;  %v2632_v2 = vpop.eup %2116 }
 0x486   :  { %v605_v24 = vpop.permute.xlu0 %604  ;;  %v841_v36 = vsel %vm311_vm15, %v2632_v2, 0.0 }
 0x487   :  { %v592_v25 = vmul.f32 %v2111_v15, %v591_v20  ;;  %625 = vmatpush.msra.mxu1 %v605_v24 }
 0x488   :  { %427 = vadd.xlane.f32.xlu1 %v426_v13 }
 0x489   :  { %v593_v28 = vadd.f32 %v2111_v15, %v592_v25 }
 0x48b   :  { %v597_v31 = vsel %vm596_vm9, %v2111_v15, %v593_v28 }
 0x48c   :  { %v602_v33 = vsel %vm599_vm10, %v601_v30, %v597_v31  ;;  %939 = vrot.lane.b32.xlu0 %v2540_v37, %s2374_s0 }
 0x48d   :  { %v603_v18 = vmul.f32 %v2103_v51, %v602_v33 }
 0x48f   :  { %2004 = vmatmul.msk.f32.vlgmr.msra.gmra.mxu1 %vm311_vm15, %v603_v18 }
 0x490   :  { %682 = vadd.xlane.f32.xlu1 %v681_v0  ;;  %524 = vrot.lane.b32.xlu2 %v2519_v35, %s2375_s22 }
 0x498   :  { %842 = vadd.xlane.f32.xlu1 %v841_v36  ;;  %859 = vrot.lane.b32.xlu2 %v2540_v37, %s2375_s22 }
 0x4b1   :  { %699 = vrot.lane.b32.xlu1 %v2540_v37, %s2368_s17 }
 0x4e3   :  { %v2640_v39 = vpop.xlane.xlu0 %507 }
 0x4e4   :  { %vm514_vm10 = vweird.f32 %v2640_v39  ;;  %v518_v31 = vand.u32 2147483647, %v2640_v39 }
 0x4eb   :  { %v763_v38 = vpop.xlane.xlu2 %762 }
 0x4ec   :  { %2118 = vrcp.f32 %v763_v38  ;;  %v775_v45 = vand.u32 2147483648, %v763_v38  ;;  %v773_v48 = vand.u32 2147483647, %v763_v38  ;;  %vm769_vm12 = vweird.f32 %v763_v38 }
 0x4ee   :  { %v776_v50 = vor.u32 1.1754944e-38, %v775_v45  ;;  %vm774_vm14 = vcmp.eq.f32.partialorder %v773_v48, 8.507059e+37 }
 0x4f2   :  { %v2119_v40 = vpop.eup %2118 }
 0x4f3   :  { %v923_v41 = vpop.xlane.xlu1 %922  ;;  %v765_v42 = vmul.f32 %v2119_v40, %v763_v38  ;;  %v525_v35 = vpop.permute.xlu2 %524  ;;  %vm770_vm11 = vweird.f32 %v2119_v40 }
 0x4f4   :  { %2120 = vrcp.f32 %v923_v41  ;;  %545 = vmatpush.msra.mxu2 %v525_v35  ;;  %vm771_vm13 = vmor %vm769_vm12, %vm770_vm11  ;;  %v935_v57 = vand.u32 2147483648, %v923_v41  ;;  %v933_v62 = vand.u32 2147483647, %v923_v41  ;;  %vm929_vm2 = vweird.f32 %v923_v41 }
 0x4f5   :  { %v766_v43 = vsub.f32 1.0, %v765_v42  ;;  %2122 = vrcp.f32 %v2640_v39  ;;  %vm519_vm12 = vcmp.eq.f32.partialorder %v518_v31, 8.507059e+37 }
 0x4f6   :  { %v780_v44 = vpop.permute.xlu0 %779  ;;  %v936_v4 = vor.u32 1.1754944e-38, %v935_v57  ;;  %vm934_vm4 = vcmp.eq.f32.partialorder %v933_v62, 8.507059e+37 }
 0x4f7   :  { %800 = vmatpush.msrb.mxu1 %v780_v44  ;;  %v767_v47 = vmul.f32 %v2119_v40, %v766_v43 }
 0x4f9   :  { %v768_v49 = vadd.f32 %v2119_v40, %v767_v47 }
 0x4fa   :  { %v2121_v37 = vpop.eup %2120 }
 0x4fb   :  { %v925_v51 = vmul.f32 %v2121_v37, %v923_v41  ;;  %v428_v52 = vpop.xlane.xlu1 %427  ;;  %v772_v53 = vsel %vm771_vm13, %v2119_v40, %v768_v49  ;;  %v2123_v54 = vpop.eup %2122  ;;  %vm930_vm1 = vweird.f32 %v2121_v37 }
 0x4fc   :  { %2124 = vrcp.f32 %v428_v52  ;;  %v777_v55 = vsel %vm774_vm14, %v776_v50, %v772_v53  ;;  %v510_v63 = vmul.f32 %v2123_v54, %v2640_v39  ;;  %vm931_vm3 = vmor %vm929_vm2, %vm930_vm1  ;;  %v440_v16 = vand.u32 2147483648, %v428_v52  ;;  %v860_v53 = vpop.permute.xlu2 %859 }
 0x4fd   :  { %v926_v56 = vsub.f32 1.0, %v925_v51  ;;  %v778_v59 = vmul.f32 %v2609_v5, %v777_v55  ;;  %v438_v20 = vand.u32 2147483647, %v428_v52  ;;  %vm434_vm6 = vweird.f32 %v428_v52 }
 0x4fe   :  { %v940_v58 = vpop.permute.xlu0 %939  ;;  %v511_v11 = vsub.f32 1.0, %v510_v63  ;;  %v441_v24 = vor.u32 1.1754944e-38, %v440_v16  ;;  %vm515_vm8 = vweird.f32 %v2123_v54 }
 0x4ff   :  { %v927_v61 = vmul.f32 %v2121_v37, %v926_v56  ;;  %960 = vmatpush.msra.mxu1 %v940_v58  ;;  %vm439_vm9 = vcmp.eq.f32.partialorder %v438_v20, 8.507059e+37  ;;  %vm516_vm11 = vmor %vm514_vm10, %vm515_vm8  ;;  %vm645_vm8 = vcmask 195584  }
 0x500   :  { %2010 = vmatmul.msk.f32.vlgmr.msrb.gmra.mxu1 %vm311_vm15, %v778_v59  ;;  %v512_v17 = vmul.f32 %v2123_v54, %v511_v11 }
 0x501   :  { %v928_v1 = vadd.f32 %v2121_v37, %v927_v61 }
 0x502   :  { %v2125_v3 = vpop.eup %2124  ;;  %v513_v13 = vadd.f32 %v2123_v54, %v512_v17 }
 0x503   :  { %v932_v6 = vsel %vm931_vm3, %v2121_v37, %v928_v1  ;;  %v430_v7 = vmul.f32 %v2125_v3, %v428_v52  ;;  %v683_v8 = vpop.xlane.xlu1 %682  ;;  %vm435_vm5 = vweird.f32 %v2125_v3  ;;  %v982_v1 = vld [vmem:[#allocation11 + $0x10] sm:$0xff] }
 0x504   :  { %v937_v12 = vsel %vm934_vm4, %v936_v4, %v932_v6  ;;  %2126 = vrcp.f32 %v683_v8  ;;  %vm436_vm7 = vmor %vm434_vm6, %vm435_vm5  ;;  %v517_v18 = vsel %vm516_vm11, %v2123_v54, %v513_v13  ;;  %v695_v44 = vand.u32 2147483648, %v683_v8  ;;  %v980_v4 = vld [vmem:[#allocation11] sm:$0xff]  ;;  %v1141_v6 = vld [vmem:[#allocation10 + $0x38] sm:$0xff] }
 0x505   :  { %v431_v5 = vsub.f32 1.0, %v430_v7  ;;  %v938_v14 = vmul.f32 %v2613_v9, %v937_v12  ;;  %v520_v9 = vand.u32 2147483648, %v2640_v39  ;;  %vm689_vm14 = vweird.f32 %v683_v8  ;;  %1162 = vmatpush.msra.mxu0 %v1141_v6 }
 0x506   :  { %v696_v48 = vor.u32 1.1754944e-38, %v695_v44 }
 0x507   :  { %v432_v15 = vmul.f32 %v2125_v3, %v431_v5  ;;  %v521_v0 = vor.u32 1.1754944e-38, %v520_v9  ;;  %v2178_v9 = vld [vmem:[#allocation2] sm:$0xff] }
 0x508   :  { %2016 = vmatmul.msk.f32.vlgmr.msra.gmra.mxu1 %vm311_vm15, %v938_v14 }
 0x509   :  { %v433_v21 = vadd.f32 %v2125_v3, %v432_v15  ;;  %v522_v40 = vsel %vm519_vm12, %v521_v0, %v517_v18  ;;  %v2179_v18 = vld [vmem:[#allocation2 + $0x8] sm:$0xff] }
 0x50a   :  { %v2127_v23 = vpop.eup %2126  ;;  %v523_v35 = vmul.f32 %v2605_v60, %v522_v40 }
 0x50b   :  { %v843_v25 = vpop.xlane.xlu1 %842  ;;  %v437_v26 = vsel %vm436_vm7, %v2125_v3, %v433_v21  ;;  %v685_v29 = vmul.f32 %v2127_v23, %v683_v8  ;;  %vm690_vm13 = vweird.f32 %v2127_v23  ;;  %v981_v3 = vld [vmem:[#allocation11 + $0x8] sm:$0xff]  ;;  %vm643_vm7 = vcmask 130048  }
 0x50c   :  { %2128 = vrcp.f32 %v843_v25  ;;  %v627_v28 = vpop.f32.mrf.mxu1  ;;  %v442_v30 = vsel %vm439_vm9, %v441_v24, %v437_v26  ;;  %vm691_vm1 = vmor %vm689_vm14, %vm690_vm13  ;;  %v855_v50 = vand.u32 2147483648, %v843_v25  ;;  %vm849_vm4 = vweird.f32 %v843_v25  ;;  %v1139_v24 = vld [vmem:[#allocation10 + $0x28] sm:$0xff]  ;;  %v2078_v26 = vld [vmem:[%s2912_s9] ss:$0 sm:$0xff] }
 0x50d   :  { %639 = vrot.lane.b32.xlu1 %v627_v28, %s2376_s23  ;;  %v443_v33 = vmul.f32 %v2617_v19, %v442_v30  ;;  %v686_v36 = vsub.f32 1.0, %v685_v29  ;;  %v693_v19 = vand.u32 2147483647, %v683_v8  ;;  %v853_v51 = vand.u32 2147483647, %v843_v25 }
 0x50e   :  { %v856_v55 = vor.u32 1.1754944e-38, %v855_v50 }
 0x50f   :  { %1998 = vmatmul.msk.f32.vlgmr.msrb.gmra.mxu2 %vm311_vm15, %v443_v33  ;;  %v687_v41 = vmul.f32 %v2127_v23, %v686_v36  ;;  %vm694_vm2 = vcmp.eq.f32.partialorder %v693_v19, 8.507059e+37  ;;  %vm854_vm6 = vcmp.eq.f32.partialorder %v853_v51, 8.507059e+37 }
 0x511   :  { %v688_v43 = vadd.f32 %v2127_v23, %v687_v41 }
 0x512   :  { %v2129_v38 = vpop.eup %2128 }
 0x513   :  { %v845_v42 = vmul.f32 %v2129_v38, %v843_v25  ;;  %v692_v45 = vsel %vm691_vm1, %v2127_v23, %v688_v43  ;;  %vm850_vm3 = vweird.f32 %v2129_v38  ;;  %v1138_v25 = vld [vmem:[#allocation10 + $0x20] sm:$0xff] }
 0x514   :  { %v697_v37 = vsel %vm694_vm2, %v696_v48, %v692_v45  ;;  %vm851_vm5 = vmor %vm849_vm4, %vm850_vm3 }
 0x515   :  { %v846_v39 = vsub.f32 1.0, %v845_v42  ;;  %v698_v52 = vmul.f32 %v2623_v32, %v697_v37 }
 0x517   :  { %2001 = vmatmul.msk.f32.vlgmr.msra.gmra.mxu2 %vm311_vm15, %v523_v35  ;;  %v847_v47 = vmul.f32 %v2129_v38, %v846_v39  ;;  %v2698_v35 = vld [vmem:[%s2910_s7 + $0x1] ss:$0 sm:$0xff] }
 0x519   :  { %v848_v49 = vadd.f32 %v2129_v38, %v847_v47 }
 0x51b   :  { %v852_v54 = vsel %vm851_vm5, %v2129_v38, %v848_v49 }
 0x51c   :  { %v857_v56 = vsel %vm854_vm6, %v856_v55, %v852_v54  ;;  %v1104_v54 = vld [vmem:[#allocation8 + $0x30] sm:$0xff] }
 0x51d   :  { %v858_v57 = vmul.f32 %v2632_v2, %v857_v56  ;;  %v983_v2 = vld [vmem:[#allocation11 + $0x18] sm:$0xff]  ;;  %v1103_v56 = vld [vmem:[#allocation8 + $0x28] sm:$0xff] }
 0x51e   :  { %1004 = vmatpush.msrb.mxu3 %v983_v2 }
 0x520   :  { %1005 = vmatpush.msrb.mxu3 %v982_v1 }
 0x522   :  { %1006 = vmatpush.msrb.mxu3 %v981_v3 }
 0x523   :  { %v700_v60 = vpop.permute.xlu1 %699 }
 0x524   :  { %720 = vmatpush.msrb.mxu2 %v700_v60  ;;  %1007 = vmatpush.msrb.mxu3 %v980_v4 }
 0x525   :  { %2007 = vmatmul.msk.f32.vlgmr.msrb.gmra.mxu2 %vm311_vm15, %v698_v52 }
 0x526   :  { %880 = vmatpush.msra.mxu2 %v860_v53  ;;  %v1105_v53 = vld [vmem:[#allocation8 + $0x38] sm:$0xff] }
 0x528   :  { %1126 = vmatpush.msrb.mxu2 %v1105_v53  ;;  %v2082_v53 = vld [vmem:[%s2908_s5 + $0x1] ss:$0 sm:$0xff] }
 0x52a   :  { %1127 = vmatpush.msrb.mxu2 %v1104_v54 }
 0x52c   :  { %1128 = vmatpush.msrb.mxu2 %v1103_v56 }
 0x52d   :  { %2013 = vmatmul.msk.f32.vlgmr.msra.gmra.mxu2 %vm311_vm15, %v858_v57 }
 0x57d   :  { %v802_v58 = vpop.f32.mrf.mxu1 }
 0x57f   :  { %v640_v12 = vpop.permute.xlu1 %639 }
 0x585   :  { %v962_v59 = vpop.f32.mrf.mxu1 }
 0x586   :  { %974 = vrot.lane.b32.xlu1 %v962_v59, %s2376_s23 }
 0x592   :  { %v467_v61 = vpop.f32.mrf.mxu2 }
 0x593   :  { %631 = vrot.lane.b32.xlu2 %v467_v61, %s2360_s30 }
 0x59a   :  { %v547_v32 = vpop.f32.mrf.mxu2 }
 0x59b   :  { %635 = vrot.lane.b32.xlu0 %v547_v32, %s2377_s24  ;;  %966 = vrot.lane.b32.xlu2 %v802_v58, %s2360_s30  ;;  %v1102_v58 = vld [vmem:[#allocation8 + $0x20] sm:$0xff] }
 0x59c   :  { %1129 = vmatpush.msrb.mxu2 %v1102_v58 }
 0x5a8   :  { %v722_v62 = vpop.f32.mrf.mxu2 }
 0x5b0   :  { %v882_v63 = vpop.f32.mrf.mxu2 }
 0x5b1   :  { %970 = vrot.lane.b32.xlu0 %v882_v63, %s2377_s24 }
 0x5ed   :  { %v632_v7 = vpop.permute.xlu2 %631 }
 0x5ee   :  { %v642_v8 = vsel %vm311_vm15, %v2584_v22, %v632_v7  ;;  %v1140_v22 = vld [vmem:[#allocation10 + $0x30] sm:$0xff] }
 0x5ef   :  { %1163 = vmatpush.msra.mxu0 %v1140_v22 }
 0x5f1   :  { %1164 = vmatpush.msra.mxu0 %v1139_v24 }
 0x5f3   :  { %1165 = vmatpush.msra.mxu0 %v1138_v25 }
 0x5f5   :  { %v967_v15 = vpop.permute.xlu2 %966 }
 0x5f6   :  { %v977_v16 = vsel %vm311_vm15, %v722_v62, %v967_v15 }
 0x5f8   :  { %v975_v20 = vpop.permute.xlu1 %974 }
 0x60d   :  { %v636_v11 = vpop.permute.xlu0 %635 }
 0x60e   :  { %v644_v5 = vsel %vm643_vm7, %v642_v8, %v636_v11 }
 0x60f   :  { %v646_v14 = vsel %vm645_vm8, %v644_v5, %v640_v12 }
 0x610   :  { %2017 = vmatmul.msk.f32.vlgmr.msrb.gmra.mxu3 %vm144_vm0, %v646_v14 }
 0x623   :  { %v971_v17 = vpop.permute.xlu0 %970 }
 0x624   :  { %v978_v21 = vsel %vm643_vm7, %v977_v16, %v971_v17 }
 0x625   :  { %v979_v23 = vsel %vm645_vm8, %v978_v21, %v975_v20 }
 0x626   :  { %2018 = vmatmul.msk.f32.gmra.mxu3 %vm144_vm0, %v979_v23 }
 0x693   :  { %v1009_v13 = vpop.f32.mrf.mxu3 }
 0x694   :  { %v1010_v28 = vadd.f32 %v2078_v26, %v1009_v13  ;;  %v2080_v13 = vld [vmem:[#allocation7 + $0x1] ss:$0 sm:$0xff] }
 0x696   :  { %v2677_v29 = vadd.f32 %v2178_v9, %v1010_v28 }
 0x698   :  { %2021 = vmatmul.msk.f32.vlgmr.msra.gmra.mxu0 %vm144_vm0, %v2677_v29  ;;  %v1019_v30 = vsel %vm144_vm0, %v2677_v29, 0.0 }
 0x699   :  { %1020 = vadd.xlane.f32.xlu2 %v1019_v30 }
 0x6a9   :  { %v1012_v31 = vpop.f32.mrf.mxu3 }
 0x6aa   :  { %v1013_v33 = vadd.f32 %v2078_v26, %v1012_v31 }
 0x6ac   :  { %v2683_v0 = vadd.f32 %v2179_v18, %v1013_v33  ;;  %v2081_v33 = vld [vmem:[%s2906_s3 + $0x1] ss:$0 sm:$0xff] }
 0x6ae   :  { %2022 = vmatmul.msk.f32.gmra.mxu0 %vm144_vm0, %v2683_v0  ;;  %v1022_v36 = vsel %vm144_vm0, %v2683_v0, 0.0 }
 0x6af   :  { %1023 = vadd.xlane.f32.xlu0 %v1022_v36 }
 0x70c   :  { %v1021_v38 = vpop.xlane.xlu2 %1020 }
 0x70d   :  { %v1025_v40 = vmul.f32 %v1021_v38, %v2485_v10 }
 0x70f   :  { %v2691_v41 = vsub.f32 %v2677_v29, %v1025_v40 }
 0x711   :  { %v1029_v42 = vmul.f32 %v2691_v41, %v2691_v41 }
 0x713   :  { %v1031_v43 = vsel %vm144_vm0, %v1029_v42, 0.0 }
 0x714   :  { %1032 = vadd.xlane.f32.xlu1 %v1031_v43 }
 0x715   :  { %v1167_v39 = vpop.f32.mrf.mxu0 }
 0x716   :  { %v2702_v44 = vadd.f32 %v2698_v35, %v1167_v39 }
 0x718   :  { %2023 = vmatpush.xpose.msk.msrb.mxu1 %vm311_vm15, %v2702_v44  ;;  %1253 = vrot.lane.b32.xlu0 %v2702_v44, %s2369_s18 }
 0x722   :  { %v1024_v19 = vpop.xlane.xlu0 %1023 }
 0x723   :  { %v1026_v45 = vmul.f32 %v1024_v19, %v2485_v10 }
 0x725   :  { %v2710_v47 = vsub.f32 %v2683_v0, %v1026_v45 }
 0x727   :  { %v1030_v48 = vmul.f32 %v2710_v47, %v2710_v47 }
 0x729   :  { %v1034_v37 = vsel %vm144_vm0, %v1030_v48, 0.0 }
 0x72a   :  { %1035 = vadd.xlane.f32.xlu2 %v1034_v37 }
 0x72b   :  { %v1170_v56 = vpop.f32.mrf.mxu0 }
 0x742   :  { %1413 = vrot.lane.b32.xlu2 %v2702_v44, %s2371_s20 }
 0x787   :  { %v1033_v49 = vpop.xlane.xlu1 %1032 }
 0x788   :  { %v1037_v50 = vmul.f32 %v1033_v49, %v2501_v27 }
 0x78a   :  { %2130 = vrsqrt.f32 %v1037_v50  ;;  %v1254_v51 = vpop.permute.xlu0 %1253  ;;  %vm1046_vm9 = vcmp.eq.f32.partialorder %v1037_v50, inf  ;;  %v1049_v62 = vand.u32 2147483648, %v1037_v50  ;;  %vm1048_vm10 = vcmp.eq.f32.partialorder %v1037_v50, 0.0 }
 0x78b   :  { %2026 = vmatpush.xpose.msk.msra.mxu3 %vm311_vm15, %v1254_v51 }
 0x790   :  { %v2131_v60 = vpop.eup %2130 }
 0x791   :  { %v1040_v52 = vmul.f32 %v2131_v60, %v1037_v50 }
 0x793   :  { %v1041_v55 = vmul.f32 %v2131_v60, %v1040_v52 }
 0x795   :  { %v1042_v57 = vmul.f32 0.5, %v1041_v55 }
 0x797   :  { %v1043_v59 = vsub.f32 1.5, %v1042_v57  ;;  %v2735_v57 = vadd.f32 %v2698_v35, %v1170_v56 }
 0x799   :  { %v1044_v61 = vmul.f32 %v2131_v60, %v1043_v59 }
 0x79b   :  { %v1045_v32 = vmul.f32 %v1044_v61, %v1037_v50 }
 0x79d   :  { %v1036_v63 = vpop.xlane.xlu2 %1035  ;;  %v1047_v2 = vsel %vm1046_vm9, %v1037_v50, %v1045_v32 }
 0x79e   :  { %v1038_v1 = vmul.f32 %v1036_v63, %v2501_v27  ;;  %v1050_v3 = vsel %vm1048_vm10, %v1049_v62, %v1047_v2 }
 0x79f   :  { %v1063_v4 = vadd.f32 1e-06, %v1050_v3 }
 0x7a0   :  { %2132 = vrsqrt.f32 %v1038_v1  ;;  %vm1058_vm1 = vcmp.eq.f32.partialorder %v1038_v1, inf  ;;  %v1061_v28 = vand.u32 2147483648, %v1038_v1  ;;  %vm1060_vm2 = vcmp.eq.f32.partialorder %v1038_v1, 0.0 }
 0x7a1   :  { %2134 = vrcp.f32 %v1063_v4  ;;  %v1076_v16 = vand.u32 2147483648, %v1063_v4  ;;  %v1074_v21 = vand.u32 2147483647, %v1063_v4  ;;  %vm1070_vm12 = vweird.f32 %v1063_v4 }
 0x7a3   :  { %v1077_v24 = vor.u32 1.1754944e-38, %v1076_v16  ;;  %vm1075_vm14 = vcmp.eq.f32.partialorder %v1074_v21, 8.507059e+37 }
 0x7a5   :  { %v1414_v6 = vpop.permute.xlu2 %1413 }
 0x7a6   :  { %v2133_v7 = vpop.eup %2132  ;;  %2032 = vmatpush.xpose.msk.msrb.mxu3 %vm311_vm15, %v1414_v6 }
 0x7a7   :  { %v1052_v8 = vmul.f32 %v2133_v7, %v1038_v1  ;;  %v2135_v11 = vpop.eup %2134 }
 0x7a8   :  { %v1066_v5 = vmul.f32 %v2135_v11, %v1063_v4  ;;  %vm1071_vm11 = vweird.f32 %v2135_v11 }
 0x7a9   :  { %v1053_v12 = vmul.f32 %v2133_v7, %v1052_v8  ;;  %vm1072_vm13 = vmor %vm1070_vm12, %vm1071_vm11 }
 0x7aa   :  { %v1067_v15 = vsub.f32 1.0, %v1066_v5 }
 0x7ab   :  { %v1054_v14 = vmul.f32 0.5, %v1053_v12 }
 0x7ac   :  { %v1068_v20 = vmul.f32 %v2135_v11, %v1067_v15 }
 0x7ad   :  { %v1055_v17 = vsub.f32 1.5, %v1054_v14 }
 0x7ae   :  { %v1069_v22 = vadd.f32 %v2135_v11, %v1068_v20 }
 0x7af   :  { %v1056_v23 = vmul.f32 %v2133_v7, %v1055_v17 }
 0x7b0   :  { %v1073_v26 = vsel %vm1072_vm13, %v2135_v11, %v1069_v22 }
 0x7b1   :  { %v1057_v25 = vmul.f32 %v1056_v23, %v1038_v1  ;;  %v1078_v9 = vsel %vm1075_vm14, %v1077_v24, %v1073_v26 }
 0x7b2   :  { %v1093_v31 = vmul.f32 %v1078_v9, %v2691_v41 }
 0x7b3   :  { %v1059_v30 = vsel %vm1058_vm1, %v1038_v1, %v1057_v25 }
 0x7b4   :  { %v1062_v18 = vsel %vm1060_vm2, %v1061_v28, %v1059_v30  ;;  %v1096_v36 = vmul.f32 %v2080_v13, %v1093_v31 }
 0x7b5   :  { %v1064_v38 = vadd.f32 1e-06, %v1062_v18 }
 0x7b6   :  { %v1099_v40 = vadd.f32 %v2081_v33, %v1096_v36 }
 0x7b7   :  { %2136 = vrcp.f32 %v1064_v38  ;;  %v1090_v19 = vand.u32 2147483648, %v1064_v38  ;;  %v1088_v48 = vand.u32 2147483647, %v1064_v38  ;;  %vm1084_vm4 = vweird.f32 %v1064_v38 }
 0x7b8   :  { %2019 = vmatmul.msk.f32.vlgmr.msrb.gmra.mxu2 %vm144_vm0, %v1099_v40 }
 0x7b9   :  { %v1091_v41 = vor.u32 1.1754944e-38, %v1090_v19  ;;  %vm1089_vm6 = vcmp.eq.f32.partialorder %v1088_v48, 8.507059e+37 }
 0x7bd   :  { %v2137_v42 = vpop.eup %2136 }
 0x7be   :  { %v1080_v43 = vmul.f32 %v2137_v42, %v1064_v38  ;;  %vm1085_vm3 = vweird.f32 %v2137_v42 }
 0x7bf   :  { %vm1086_vm5 = vmor %vm1084_vm4, %vm1085_vm3 }
 0x7c0   :  { %v1081_v39 = vsub.f32 1.0, %v1080_v43 }
 0x7c2   :  { %v1082_v45 = vmul.f32 %v2137_v42, %v1081_v39 }
 0x7c4   :  { %v1083_v37 = vadd.f32 %v2137_v42, %v1082_v45 }
 0x7c6   :  { %v1087_v49 = vsel %vm1086_vm5, %v2137_v42, %v1083_v37 }
 0x7c7   :  { %v1092_v50 = vsel %vm1089_vm6, %v1091_v41, %v1087_v49 }
 0x7c8   :  { %v1094_v51 = vmul.f32 %v1092_v50, %v2710_v47 }
 0x7ca   :  { %v1097_v60 = vmul.f32 %v2080_v13, %v1094_v51 }
 0x7cc   :  { %v1100_v52 = vadd.f32 %v2081_v33, %v1097_v60 }
 0x7ce   :  { %2020 = vmatmul.msk.f32.gmra.mxu2 %vm144_vm0, %v1100_v52 }
 0x83b   :  { %v1131_v54 = vpop.f32.mrf.mxu2 }
 0x83c   :  { %v1132_v55 = vadd.f32 %v2082_v53, %v1131_v54 }
 0x83e   :  { %1251 = vrot.lane.b32.xlu1 %v1132_v55, %s2369_s18  ;;  %2024 = vmatmul.msk.f32.vlgmr.msrb.gmra.mxu1 %vm311_vm15, %v1132_v55 }
 0x83f   :  { %1411 = vrot.lane.b32.xlu0 %v1132_v55, %s2371_s20 }
 0x846   :  { %1586 = vrot.lane.b32.xlu1 %v2735_v57, %s2369_s18 }
 0x847   :  { %1333 = vrot.lane.b32.xlu0 %v2702_v44, %s2370_s19 }
 0x84e   :  { %1331 = vrot.lane.b32.xlu1 %v1132_v55, %s2370_s19 }
 0x84f   :  { %1746 = vrot.lane.b32.xlu0 %v2735_v57, %s2371_s20 }
 0x851   :  { %v1134_v47 = vpop.f32.mrf.mxu2 }
 0x852   :  { %v1135_v58 = vadd.f32 %v2082_v53, %v1134_v47 }
 0x854   :  { %1584 = vrot.lane.b32.xlu2 %v1135_v58, %s2369_s18 }
 0x856   :  { %1666 = vrot.lane.b32.xlu1 %v2735_v57, %s2370_s19 }
 0x857   :  { %1664 = vrot.lane.b32.xlu0 %v1135_v58, %s2370_s19 }
 0x85c   :  { %1744 = vrot.lane.b32.xlu2 %v1135_v58, %s2371_s20 }
 0x8ae   :  { %v1585_v1 = vpop.permute.xlu2 %1584 }
 0x8b0   :  { %v1252_v35 = vpop.permute.xlu1 %1251 }
 0x8b1   :  { %v1412_v59 = vpop.permute.xlu0 %1411  ;;  %2027 = vmatmul.msk.f32.vlgmr.msra.gmra.mxu3 %vm311_vm15, %v1252_v35 }
 0x8b6   :  { %v1745_v8 = vpop.permute.xlu2 %1744 }
 0x8b8   :  { %v1587_v61 = vpop.permute.xlu1 %1586 }
 0x8b9   :  { %v1334_v32 = vpop.permute.xlu0 %1333  ;;  %2033 = vmatmul.msk.f32.vlgmr.msrb.gmra.mxu3 %vm311_vm15, %v1412_v59 }
 0x8ba   :  { %2029 = vmatpush.xpose.msk.msrb.mxu0 %vm311_vm15, %v1334_v32  ;;  %2038 = vmatpush.xpose.msk.msra.mxu3 %vm311_vm15, %v1587_v61 }
 0x8bb   :  { %v1196_v62 = vpop.f32.mrf.mxu1 }
 0x8bc   :  { %v1199_v63 = vmul.f32 0.35355338, %v1196_v62 }
 0x8be   :  { %2035 = vmatpush.xpose.msk.msra.mxu0 %vm311_vm15, %v2735_v57  ;;  %v1200_v2 = vadd.f32 %v1199_v63, %v2552_v46 }
 0x8c0   :  { %v1332_v3 = vpop.permute.xlu1 %1331  ;;  %v1201_v4 = vsel %vm311_vm15, %v1200_v2, -inf }
 0x8c1   :  { %v1747_v6 = vpop.permute.xlu0 %1746  ;;  %1202 = vmax.xlane.f32.xlu1 %v1201_v4  ;;  %2030 = vmatmul.msk.f32.vlgmr.msrb.gmra.mxu0 %vm311_vm15, %v1332_v3 }
 0x8c2   :  { %2039 = vmatmul.msk.f32.vlgmr.msra.gmra.mxu3 %vm311_vm15, %v1585_v1 }
 0x8c3   :  { %2044 = vmatpush.xpose.msk.msrb.mxu3 %vm311_vm15, %v1747_v6 }
 0x8c8   :  { %v1667_v7 = vpop.permute.xlu1 %1666 }
 0x8c9   :  { %2036 = vmatmul.msk.f32.vlgmr.msra.gmra.mxu0 %vm311_vm15, %v1135_v58  ;;  %v1665_v11 = vpop.permute.xlu0 %1664 }
 0x8ca   :  { %2041 = vmatpush.xpose.msk.msrb.mxu0 %vm311_vm15, %v1667_v7  ;;  %2045 = vmatmul.msk.f32.vlgmr.msrb.gmra.mxu3 %vm311_vm15, %v1745_v8 }
 0x8d1   :  { %2042 = vmatmul.msk.f32.vlgmr.msrb.gmra.mxu0 %vm311_vm15, %v1665_v11 }
 0x934   :  { %v1276_v12 = vpop.f32.mrf.mxu3  ;;  %v1203_v15 = vpop.xlane.xlu1 %1202 }
 0x935   :  { %v1204_v20 = vsub.f32 %v1200_v2, %v1203_v15  ;;  %v1279_v21 = vmul.f32 0.35355338, %v1276_v12 }
 0x937   :  { %v1205_v22 = vmul.f32 1.442695, %v1204_v20  ;;  %v1280_v13 = vadd.f32 %v1279_v21, %v2552_v46 }
 0x939   :  { %2138 = vpow2.f32 %v1205_v22  ;;  %v1281_v31 = vsel %vm311_vm15, %v1280_v13, -inf }
 0x93c   :  { %v1436_v5 = vpop.f32.mrf.mxu3 }
 0x93d   :  { %v1439_v9 = vmul.f32 0.35355338, %v1436_v5 }
 0x93e   :  { %v1356_v14 = vpop.f32.mrf.mxu0 }
 0x93f   :  { %v1359_v16 = vmul.f32 0.35355338, %v1356_v14  ;;  %v1440_v36 = vadd.f32 %v1439_v9, %v2552_v46  ;;  %v2771_v38 = vpop.eup %2138 }
 0x940   :  { %v1207_v19 = vsel %vm311_vm15, %v2771_v38, 0.0 }
 0x941   :  { %v1360_v17 = vadd.f32 %v1359_v16, %v2552_v46  ;;  %v1441_v39 = vsel %vm311_vm15, %v1440_v36, -inf }
 0x943   :  { %v1361_v23 = vsel %vm311_vm15, %v1360_v17, -inf }
 0x944   :  { %1362 = vmax.xlane.f32.xlu2 %v1361_v23 }
 0x945   :  { %v1609_v24 = vpop.f32.mrf.mxu3 }
 0x946   :  { %v1529_v25 = vpop.f32.mrf.mxu0  ;;  %v1612_v48 = vmul.f32 0.35355338, %v1609_v24 }
 0x947   :  { %v1532_v26 = vmul.f32 0.35355338, %v1529_v25 }
 0x948   :  { %v1613_v37 = vadd.f32 %v1612_v48, %v2591_v34 }
 0x949   :  { %v1533_v28 = vadd.f32 %v1532_v26, %v2591_v34 }
 0x94a   :  { %v1614_v49 = vsel %vm311_vm15, %v1613_v37, -inf }
 0x94b   :  { %v1534_v30 = vsel %vm311_vm15, %v1533_v28, -inf }
 0x94c   :  { %1535 = vmax.xlane.f32.xlu0 %v1534_v30  ;;  %1282 = vmax.xlane.f32.xlu2 %v1281_v31 }
 0x94d   :  { %v1769_v40 = vpop.f32.mrf.mxu3 }
 0x94e   :  { %v1689_v33 = vpop.f32.mrf.mxu0  ;;  %v1772_v43 = vmul.f32 0.35355338, %v1769_v40 }
 0x94f   :  { %v1692_v18 = vmul.f32 0.35355338, %v1689_v33 }
 0x950   :  { %v2782_v46 = vadd.f32 %v1772_v43, %v2591_v34 }
 0x951   :  { %v2774_v42 = vadd.f32 %v1692_v18, %v2591_v34 }
 0x952   :  { %v1774_v41 = vsel %vm311_vm15, %v2782_v46, -inf }
 0x953   :  { %v1694_v45 = vsel %vm311_vm15, %v2774_v42, -inf }
 0x954   :  { %1442 = vmax.xlane.f32.xlu0 %v1441_v39  ;;  %1208 = vadd.xlane.f32.xlu2 %v1207_v19 }
 0x955   :  { %1695 = vmax.xlane.f32.xlu1 %v1694_v45 }
 0x95c   :  { %1775 = vmax.xlane.f32.xlu2 %v1774_v41 }
 0x95d   :  { %1615 = vmax.xlane.f32.xlu1 %v1614_v49 }
 0x974   :  { %1225 = vrot.lane.b32.xlu2 %v2702_v44, %s2368_s17 }
 0x97c   :  { %1385 = vrot.lane.b32.xlu2 %v2702_v44, %s2375_s22 }
 0x984   :  { %1638 = vrot.lane.b32.xlu2 %v2735_v57, %s2373_s21 }
 0x9b7   :  { %v1363_v50 = vpop.xlane.xlu2 %1362 }
 0x9b8   :  { %v1364_v51 = vsub.f32 %v1360_v17, %v1363_v50 }
 0x9ba   :  { %v1365_v60 = vmul.f32 1.442695, %v1364_v51 }
 0x9bc   :  { %2140 = vpow2.f32 %v1365_v60 }
 0x9bf   :  { %v1283_v34 = vpop.xlane.xlu2 %1282  ;;  %v1536_v52 = vpop.xlane.xlu0 %1535 }
 0x9c0   :  { %v1284_v53 = vsub.f32 %v1280_v13, %v1283_v34  ;;  %v1537_v56 = vsub.f32 %v1533_v28, %v1536_v52 }
 0x9c2   :  { %v2794_v54 = vpop.eup %2140  ;;  %v1285_v55 = vmul.f32 1.442695, %v1284_v53  ;;  %v1538_v58 = vmul.f32 1.442695, %v1537_v56 }
 0x9c3   :  { %v1367_v47 = vsel %vm311_vm15, %v2794_v54, 0.0 }
 0x9c4   :  { %2142 = vpow2.f32 %v1285_v55  ;;  %1368 = vadd.xlane.f32.xlu0 %v1367_v47 }
 0x9c7   :  { %v1209_v35 = vpop.xlane.xlu2 %1208  ;;  %v1443_v59 = vpop.xlane.xlu0 %1442 }
 0x9c8   :  { %2144 = vrcp.f32 %v1209_v35  ;;  %v1696_v61 = vpop.xlane.xlu1 %1695  ;;  %v1444_v32 = vsub.f32 %v1440_v36, %v1443_v59  ;;  %v1219_v12 = vand.u32 2147483647, %v1209_v35  ;;  %v1221_v5 = vand.u32 2147483648, %v1209_v35 }
 0x9c9   :  { %2146 = vpow2.f32 %v1538_v58  ;;  %vm1215_vm10 = vweird.f32 %v1209_v35  ;;  %v1697_v30 = vsub.f32 %v2774_v42, %v1696_v61 }
 0x9ca   :  { %v2798_v62 = vpop.eup %2142  ;;  %v1445_v63 = vmul.f32 1.442695, %v1444_v32  ;;  %v1222_v23 = vor.u32 1.1754944e-38, %v1221_v5  ;;  %vm1220_vm12 = vcmp.eq.f32.partialorder %v1219_v12, 8.507059e+37 }
 0x9cb   :  { %v1287_v2 = vsel %vm311_vm15, %v2798_v62, 0.0  ;;  %v1698_v33 = vmul.f32 1.442695, %v1697_v30 }
 0x9cc   :  { %1288 = vadd.xlane.f32.xlu0 %v1287_v2  ;;  %2148 = vpow2.f32 %v1445_v63 }
 0x9ce   :  { %v2145_v1 = vpop.eup %2144 }
 0x9cf   :  { %v1211_v3 = vmul.f32 %v2145_v1, %v1209_v35  ;;  %v1776_v4 = vpop.xlane.xlu2 %1775  ;;  %v2802_v6 = vpop.eup %2146  ;;  %vm1216_vm9 = vweird.f32 %v2145_v1 }
 0x9d0   :  { %v1616_v7 = vpop.xlane.xlu1 %1615  ;;  %v1540_v16 = vsel %vm311_vm15, %v2802_v6, 0.0  ;;  %vm1217_vm11 = vmor %vm1215_vm10, %vm1216_vm9  ;;  %v1777_v31 = vsub.f32 %v2782_v46, %v1776_v4 }
 0x9d1   :  { %v1212_v8 = vsub.f32 1.0, %v1211_v3  ;;  %v1617_v11 = vsub.f32 %v1613_v37, %v1616_v7 }
 0x9d2   :  { %v2806_v17 = vpop.eup %2148  ;;  %v1778_v18 = vmul.f32 1.442695, %v1777_v31 }
 0x9d3   :  { %v1213_v14 = vmul.f32 %v2145_v1, %v1212_v8  ;;  %v1618_v15 = vmul.f32 1.442695, %v1617_v11  ;;  %v1447_v21 = vsel %vm311_vm15, %v2806_v17, 0.0 }
 0x9d4   :  { %1541 = vadd.xlane.f32.xlu0 %v1540_v16  ;;  %1448 = vadd.xlane.f32.xlu1 %v1447_v21 }
 0x9d5   :  { %v1214_v20 = vadd.f32 %v2145_v1, %v1213_v14  ;;  %2150 = vpow2.f32 %v1618_v15 }
 0x9d6   :  { %2152 = vpow2.f32 %v1698_v33 }
 0x9d7   :  { %v1218_v22 = vsel %vm1217_vm11, %v2145_v1, %v1214_v20  ;;  %v1226_v24 = vpop.permute.xlu2 %1225  ;;  %2154 = vpow2.f32 %v1778_v18 }
 0x9d8   :  { %v1223_v25 = vsel %vm1220_vm12, %v1222_v23, %v1218_v22  ;;  %1246 = vmatpush.msra.mxu1 %v1226_v24 }
 0x9d9   :  { %v1224_v26 = vmul.f32 %v2771_v38, %v1223_v25 }
 0x9db   :  { %v2811_v13 = vpop.eup %2150  ;;  %2025 = vmatmul.msk.f32.vlgmr.msra.gmra.mxu1 %vm311_vm15, %v1224_v26 }
 0x9dc   :  { %v1620_v28 = vsel %vm311_vm15, %v2811_v13, 0.0  ;;  %v2826_v36 = vpop.eup %2152 }
 0x9dd   :  { %1621 = vadd.xlane.f32.xlu2 %v1620_v28  ;;  %v2828_v38 = vpop.eup %2154 }
 0x9de   :  { %v1780_v40 = vsel %vm311_vm15, %v2828_v38, 0.0 }
 0x9df   :  { %v1386_v9 = vpop.permute.xlu2 %1385 }
 0x9e0   :  { %1406 = vmatpush.msrb.mxu1 %v1386_v9 }
 0x9e8   :  { %1465 = vrot.lane.b32.xlu0 %v2702_v44, %s2374_s0 }
 0x9ed   :  { %1305 = vrot.lane.b32.xlu1 %v2702_v44, %s2373_s21  ;;  %v1700_v44 = vsel %vm311_vm15, %v2826_v36, 0.0 }
 0x9f0   :  { %1558 = vrot.lane.b32.xlu0 %v2735_v57, %s2368_s17 }
 0x9f5   :  { %1798 = vrot.lane.b32.xlu2 %v2735_v57, %s2374_s0 }
 0xa17   :  { %1701 = vadd.xlane.f32.xlu1 %v1700_v44 }
 0xa1a   :  { %1781 = vadd.xlane.f32.xlu0 %v1780_v40 }
 0xa2e   :  { %1718 = vrot.lane.b32.xlu0 %v2735_v57, %s2375_s22  ;;  %v1639_v57 = vpop.permute.xlu2 %1638 }
 0xa37   :  { %v1369_v42 = vpop.xlane.xlu0 %1368 }
 0xa38   :  { %2156 = vrcp.f32 %v1369_v42  ;;  %v1381_v48 = vand.u32 2147483648, %v1369_v42  ;;  %v1379_v37 = vand.u32 2147483647, %v1369_v42  ;;  %vm1375_vm14 = vweird.f32 %v1369_v42 }
 0xa3a   :  { %v1382_v49 = vor.u32 1.1754944e-38, %v1381_v48  ;;  %vm1380_vm2 = vcmp.eq.f32.partialorder %v1379_v37, 8.507059e+37 }
 0xa3e   :  { %v2157_v43 = vpop.eup %2156 }
 0xa3f   :  { %v1371_v39 = vmul.f32 %v2157_v43, %v1369_v42  ;;  %v1289_v19 = vpop.xlane.xlu0 %1288  ;;  %vm1376_vm13 = vweird.f32 %v2157_v43 }
 0xa40   :  { %2158 = vrcp.f32 %v1289_v19  ;;  %vm1377_vm1 = vmor %vm1375_vm14, %vm1376_vm13  ;;  %v1301_v4 = vand.u32 2147483648, %v1289_v19  ;;  %vm1295_vm5 = vweird.f32 %v1289_v19  ;;  %v1299_v8 = vand.u32 2147483647, %v1289_v19 }
 0xa41   :  { %v1372_v45 = vsub.f32 1.0, %v1371_v39 }
 0xa42   :  { %v1302_v20 = vor.u32 1.1754944e-38, %v1301_v4  ;;  %vm1300_vm11 = vcmp.eq.f32.partialorder %v1299_v8, 8.507059e+37 }
 0xa43   :  { %v1373_v46 = vmul.f32 %v2157_v43, %v1372_v45 }
 0xa45   :  { %v1374_v41 = vadd.f32 %v2157_v43, %v1373_v46 }
 0xa46   :  { %v2159_v60 = vpop.eup %2158 }
 0xa47   :  { %v1378_v50 = vsel %vm1377_vm1, %v2157_v43, %v1374_v41  ;;  %v1542_v51 = vpop.xlane.xlu0 %1541  ;;  %v1449_v52 = vpop.xlane.xlu1 %1448  ;;  %v1291_v55 = vmul.f32 %v2159_v60, %v1289_v19  ;;  %vm1296_vm3 = vweird.f32 %v2159_v60 }
 0xa48   :  { %v1383_v34 = vsel %vm1380_vm2, %v1382_v49, %v1378_v50  ;;  %2160 = vrcp.f32 %v1542_v51  ;;  %v1554_v11 = vand.u32 2147483648, %v1542_v51  ;;  %vm1297_vm6 = vmor %vm1295_vm5, %vm1296_vm3  ;;  %vm1548_vm9 = vweird.f32 %v1542_v51 }
 0xa49   :  { %v1384_v53 = vmul.f32 %v2794_v54, %v1383_v34  ;;  %2162 = vrcp.f32 %v1449_v52  ;;  %v1292_v47 = vsub.f32 1.0, %v1291_v55  ;;  %v1552_v12 = vand.u32 2147483647, %v1542_v51 }
 0xa4a   :  { %v1555_v23 = vor.u32 1.1754944e-38, %v1554_v11  ;;  %v1461_v28 = vand.u32 2147483648, %v1449_v52  ;;  %vm1455_vm14 = vweird.f32 %v1449_v52  ;;  %v1459_v9 = vand.u32 2147483647, %v1449_v52 }
 0xa4b   :  { %2031 = vmatmul.msk.f32.vlgmr.msrb.gmra.mxu1 %vm311_vm15, %v1384_v53  ;;  %v1293_v32 = vmul.f32 %v2159_v60, %v1292_v47  ;;  %vm1553_vm12 = vcmp.eq.f32.partialorder %v1552_v12, 8.507059e+37 }
 0xa4c   :  { %v1462_v42 = vor.u32 1.1754944e-38, %v1461_v28  ;;  %vm1460_vm2 = vcmp.eq.f32.partialorder %v1459_v9, 8.507059e+37 }
 0xa4d   :  { %v1294_v1 = vadd.f32 %v2159_v60, %v1293_v32 }
 0xa4e   :  { %v2161_v56 = vpop.eup %2160 }
 0xa4f   :  { %v1544_v58 = vmul.f32 %v2161_v56, %v1542_v51  ;;  %v2163_v35 = vpop.eup %2162  ;;  %vm1549_vm4 = vweird.f32 %v2161_v56  ;;  %v1298_v14 = vsel %vm1297_vm6, %v2159_v60, %v1294_v1 }
 0xa50   :  { %v2838_v59 = vpop.xlane.xlu2 %1621  ;;  %v1451_v63 = vmul.f32 %v2163_v35, %v1449_v52  ;;  %vm1550_vm10 = vmor %vm1548_vm9, %vm1549_vm4  ;;  %v1303_v22 = vsel %vm1300_vm11, %v1302_v20, %v1298_v14  ;;  %vm1456_vm13 = vweird.f32 %v2163_v35 }
 0xa51   :  { %v1545_v61 = vsub.f32 1.0, %v1544_v58  ;;  %2164 = vrcp.f32 %v2838_v59  ;;  %v1304_v31 = vmul.f32 %v2798_v62, %v1303_v22  ;;  %vm1457_vm1 = vmor %vm1455_vm14, %vm1456_vm13  ;;  %v1634_v62 = vand.u32 2147483648, %v2838_v59 }
 0xa52   :  { %v1452_v3 = vsub.f32 1.0, %v1451_v63  ;;  %vm1628_vm4 = vweird.f32 %v2838_v59 }
 0xa53   :  { %v1546_v2 = vmul.f32 %v2161_v56, %v1545_v61  ;;  %v1635_v46 = vor.u32 1.1754944e-38, %v1634_v62 }
 0xa54   :  { %v1453_v15 = vmul.f32 %v2163_v35, %v1452_v3 }
 0xa55   :  { %v1547_v7 = vadd.f32 %v2161_v56, %v1546_v2 }
 0xa56   :  { %v1454_v24 = vadd.f32 %v2163_v35, %v1453_v15  ;;  %v1843_v15 = vld [vmem:[#allocation11 + $0x38] sm:$0xff] }
 0xa57   :  { %v2165_v54 = vpop.eup %2164  ;;  %v1551_v21 = vsel %vm1550_vm10, %v2161_v56, %v1547_v7  ;;  %1864 = vmatpush.msra.mxu0 %v1843_v15 }
 0xa58   :  { %v1624_v16 = vmul.f32 %v2165_v54, %v2838_v59  ;;  %v1556_v25 = vsel %vm1553_vm12, %v1555_v23, %v1551_v21  ;;  %v1458_v44 = vsel %vm1457_vm1, %v2163_v35, %v1454_v24  ;;  %vm1629_vm3 = vweird.f32 %v2165_v54  ;;  %v1799_v48 = vpop.permute.xlu2 %1798  ;;  %v1248_v8 = vpop.f32.mrf.mxu1  ;;  %v1841_v21 = vld [vmem:[#allocation11 + $0x28] sm:$0xff]  ;;  %v1840_v23 = vld [vmem:[#allocation11 + $0x20] sm:$0xff] }
 0xa59   :  { %v1557_v18 = vmul.f32 %v2802_v6, %v1556_v25  ;;  %v1463_v43 = vsel %vm1460_vm2, %v1462_v42, %v1458_v44  ;;  %v1632_v6 = vand.u32 2147483647, %v2838_v59  ;;  %vm1630_vm5 = vmor %vm1628_vm4, %vm1629_vm3  ;;  %v2083_v42 = vld [vmem:[%s2912_s9 + $0x1] ss:$0 sm:$0xff] }
 0xa5a   :  { %v1466_v5 = vpop.permute.xlu0 %1465  ;;  %v1625_v26 = vsub.f32 1.0, %v1624_v16  ;;  %v1464_v19 = vmul.f32 %v2806_v17, %v1463_v43  ;;  %v1842_v16 = vld [vmem:[#allocation11 + $0x30] sm:$0xff] }
 0xa5b   :  { %vm1633_vm6 = vcmp.eq.f32.partialorder %v1632_v6, 8.507059e+37  ;;  %1865 = vmatpush.msra.mxu0 %v1842_v16 }
 0xa5c   :  { %v1626_v40 = vmul.f32 %v2165_v54, %v1625_v26 }
 0xa5d   :  { %1866 = vmatpush.msra.mxu0 %v1841_v21 }
 0xa5e   :  { %v1627_v39 = vadd.f32 %v2165_v54, %v1626_v40 }
 0xa5f   :  { %v1306_v30 = vpop.permute.xlu1 %1305  ;;  %1867 = vmatpush.msra.mxu0 %v1840_v23 }
 0xa60   :  { %1326 = vmatpush.msra.mxu2 %v1306_v30  ;;  %v1631_v45 = vsel %vm1630_vm5, %v2165_v54, %v1627_v39 }
 0xa61   :  { %2028 = vmatmul.msk.f32.vlgmr.msra.gmra.mxu2 %vm311_vm15, %v1304_v31  ;;  %v1636_v37 = vsel %vm1633_vm6, %v1635_v46, %v1631_v45 }
 0xa62   :  { %v1559_v33 = vpop.permute.xlu0 %1558  ;;  %1486 = vmatpush.msrb.mxu2 %v1466_v5  ;;  %v1637_v41 = vmul.f32 %v2811_v13, %v1636_v37 }
 0xa63   :  { %1579 = vmatpush.msra.mxu1 %v1559_v33 }
 0xa64   :  { %2037 = vmatmul.msk.f32.vlgmr.msra.gmra.mxu1 %vm311_vm15, %v1557_v18  ;;  %1659 = vmatpush.msra.mxu2 %v1639_v57 }
 0xa69   :  { %2034 = vmatmul.msk.f32.vlgmr.msrb.gmra.mxu2 %vm311_vm15, %v1464_v19 }
 0xa6a   :  { %1819 = vmatpush.msrb.mxu2 %v1799_v48 }
 0xa71   :  { %2040 = vmatmul.msk.f32.vlgmr.msra.gmra.mxu2 %vm311_vm15, %v1637_v41 }
 0xa8a   :  { %v1702_v49 = vpop.xlane.xlu1 %1701 }
 0xa8b   :  { %2166 = vrcp.f32 %v1702_v49  ;;  %v1714_v52 = vand.u32 2147483648, %v1702_v49  ;;  %v1712_v56 = vand.u32 2147483647, %v1702_v49  ;;  %vm1708_vm11 = vweird.f32 %v1702_v49 }
 0xa8d   :  { %v1782_v50 = vpop.xlane.xlu0 %1781  ;;  %v1715_v59 = vor.u32 1.1754944e-38, %v1714_v52  ;;  %vm1713_vm14 = vcmp.eq.f32.partialorder %v1712_v56, 8.507059e+37 }
 0xa8e   :  { %2168 = vrcp.f32 %v1782_v50  ;;  %v1794_v47 = vand.u32 2147483648, %v1782_v50  ;;  %v1792_v13 = vand.u32 2147483647, %v1782_v50  ;;  %vm1788_vm13 = vweird.f32 %v1782_v50 }
 0xa90   :  { %v1795_v63 = vor.u32 1.1754944e-38, %v1794_v47  ;;  %vm1793_vm2 = vcmp.eq.f32.partialorder %v1792_v13, 8.507059e+37 }
 0xa91   :  { %v2167_v51 = vpop.eup %2166 }
 0xa92   :  { %v1704_v17 = vmul.f32 %v2167_v51, %v1702_v49  ;;  %vm1709_vm9 = vweird.f32 %v2167_v51 }
 0xa93   :  { %vm1710_vm12 = vmor %vm1708_vm11, %vm1709_vm9 }
 0xa94   :  { %v2169_v60 = vpop.eup %2168  ;;  %v1705_v34 = vsub.f32 1.0, %v1704_v17 }
 0xa95   :  { %v1784_v57 = vmul.f32 %v2169_v60, %v1782_v50  ;;  %vm1789_vm10 = vweird.f32 %v2169_v60 }
 0xa96   :  { %v1706_v55 = vmul.f32 %v2167_v51, %v1705_v34  ;;  %vm1790_vm1 = vmor %vm1788_vm13, %vm1789_vm10 }
 0xa97   :  { %v1785_v53 = vsub.f32 1.0, %v1784_v57 }
 0xa98   :  { %v1707_v35 = vadd.f32 %v2167_v51, %v1706_v55 }
 0xa99   :  { %v1786_v58 = vmul.f32 %v2169_v60, %v1785_v53 }
 0xa9a   :  { %v1711_v32 = vsel %vm1710_vm12, %v2167_v51, %v1707_v35 }
 0xa9b   :  { %v1787_v61 = vadd.f32 %v2169_v60, %v1786_v58  ;;  %v1716_v2 = vsel %vm1713_vm14, %v1715_v59, %v1711_v32 }
 0xa9c   :  { %v1717_v7 = vmul.f32 %v2826_v36, %v1716_v2 }
 0xa9d   :  { %v1791_v1 = vsel %vm1790_vm1, %v2169_v60, %v1787_v61 }
 0xa9e   :  { %v1796_v3 = vsel %vm1793_vm2, %v1795_v63, %v1791_v1 }
 0xa9f   :  { %v1797_v54 = vmul.f32 %v2828_v38, %v1796_v3 }
 0xaa0   :  { %v1719_v4 = vpop.permute.xlu0 %1718 }
 0xaa1   :  { %1739 = vmatpush.msrb.mxu1 %v1719_v4  ;;  %2046 = vmatmul.msk.f32.vlgmr.msrb.gmra.mxu2 %vm311_vm15, %v1797_v54 }
 0xaa2   :  { %2043 = vmatmul.msk.f32.vlgmr.msrb.gmra.mxu1 %vm311_vm15, %v1717_v7 }
 0xac8   :  { %v1408_v11 = vpop.f32.mrf.mxu1 }
 0xac9   :  { %1496 = vrot.lane.b32.xlu0 %v1408_v11, %s2377_s24 }
 0xae1   :  { %v1581_v38 = vpop.f32.mrf.mxu1 }
 0xae4   :  { %v1328_v12 = vpop.f32.mrf.mxu2 }
 0xae5   :  { %1492 = vrot.lane.b32.xlu2 %v1328_v12, %s2360_s30  ;;  %v2084_v12 = vld [vmem:[%s2913_s10] ss:$0 sm:$0xff]  ;;  %s2378_s10 = smov [#allocation13]  }
 0xaec   :  { %v1488_v5 = vpop.f32.mrf.mxu2 }
 0xaed   :  { %1500 = vrot.lane.b32.xlu2 %v1488_v5, %s2376_s23 }
 0xaf4   :  { %v1661_v14 = vpop.f32.mrf.mxu2 }
 0xaf5   :  { %1825 = vrot.lane.b32.xlu0 %v1661_v14, %s2360_s30 }
 0xb1f   :  { %v1741_v36 = vpop.f32.mrf.mxu1 }
 0xb20   :  { %1829 = vrot.lane.b32.xlu2 %v1741_v36, %s2377_s24 }
 0xb24   :  { %v1821_v20 = vpop.f32.mrf.mxu2 }
 0xb25   :  { %1833 = vrot.lane.b32.xlu1 %v1821_v20, %s2376_s23 }
 0xb3b   :  { %v1497_v25 = vpop.permute.xlu0 %1496 }
 0xb3f   :  { %v1493_v22 = vpop.permute.xlu2 %1492 }
 0xb40   :  { %v1503_v24 = vsel %vm311_vm15, %v1248_v8, %v1493_v22 }
 0xb41   :  { %v1504_v28 = vsel %vm643_vm7, %v1503_v24, %v1497_v25 }
 0xb47   :  { %v1501_v26 = vpop.permute.xlu2 %1500 }
 0xb48   :  { %v1505_v9 = vsel %vm645_vm8, %v1504_v28, %v1501_v26 }
 0xb49   :  { %2047 = vmatmul.msk.f32.vlgmr.msra.gmra.mxu0 %vm144_vm0, %v1505_v9 }
 0xb67   :  { %v1826_v30 = vpop.permute.xlu0 %1825 }
 0xb68   :  { %v1836_v33 = vsel %vm311_vm15, %v1581_v38, %v1826_v30  ;;  %v2085_v38 = vld [vmem:[%s2914_s11] ss:$0 sm:$0xff]  ;;  %s1971_s11 = sshll.u32 %s2378_s10, 4  ;;  %s1972_s11 = int_to_ptr.vmem [resolvable:$true] %s1971_s11 }
 0xb7a   :  { %v1830_v31 = vpop.permute.xlu2 %1829 }
 0xb7b   :  { %v1837_v18 = vsel %vm643_vm7, %v1836_v33, %v1830_v31 }
 0xb97   :  { %v1834_v44 = vpop.permute.xlu1 %1833 }
 0xb98   :  { %v1838_v40 = vsel %vm645_vm8, %v1837_v18, %v1834_v44 }
 0xb99   :  { %2048 = vmatmul.msk.f32.gmra.mxu0 %vm144_vm0, %v1838_v40 }
 0xbc6   :  { %v1869_v43 = vpop.f32.mrf.mxu0 }
 0xbc7   :  { %v1870_v39 = vadd.f32 %v2083_v42, %v1869_v43 }
 0xbc9   :  { %v1875_v62 = vadd.f32 %v1870_v39, %v2677_v29 }
 0xbcb   :  { %v1879_v6 = vsel %vm144_vm0, %v1875_v62, 0.0 }
 0xbcc   :  { %1880 = vadd.xlane.f32.xlu0 %v1879_v6 }
 0xc16   :  { %v1872_v19 = vpop.f32.mrf.mxu0 }
 0xc17   :  { %v1873_v45 = vadd.f32 %v2083_v42, %v1872_v19 }
 0xc19   :  { %v1876_v48 = vadd.f32 %v1873_v45, %v2683_v0 }
 0xc1b   :  { %v1882_v46 = vsel %vm144_vm0, %v1876_v48, 0.0 }
 0xc1c   :  { %1883 = vadd.xlane.f32.xlu2 %v1882_v46 }
 0xc3f   :  { %v1881_v37 = vpop.xlane.xlu0 %1880 }
 0xc40   :  { %v1885_v41 = vmul.f32 %v1881_v37, %v2485_v10 }
 0xc42   :  { %v1887_v49 = vsub.f32 %v1875_v62, %v1885_v41 }
 0xc44   :  { %v1889_v50 = vmul.f32 %v1887_v49, %v1887_v49 }
 0xc46   :  { %v1891_v51 = vsel %vm144_vm0, %v1889_v50, 0.0 }
 0xc47   :  { %1892 = vadd.xlane.f32.xlu1 %v1891_v51 }
 0xc8f   :  { %v1884_v60 = vpop.xlane.xlu2 %1883 }
 0xc90   :  { %v1886_v29 = vmul.f32 %v1884_v60, %v2485_v10 }
 0xc92   :  { %v2881_v17 = vsub.f32 %v1876_v48, %v1886_v29 }
 0xc94   :  { %v1890_v57 = vmul.f32 %v2881_v17, %v2881_v17 }
 0xc96   :  { %v1894_v0 = vsel %vm144_vm0, %v1890_v57, 0.0 }
 0xc97   :  { %1895 = vadd.xlane.f32.xlu0 %v1894_v0 }
 0xcba   :  { %v1893_v34 = vpop.xlane.xlu1 %1892 }
 0xcbb   :  { %v1897_v52 = vmul.f32 %v1893_v34, %v2501_v27 }
 0xcbd   :  { %2170 = vrsqrt.f32 %v1897_v52  ;;  %vm1906_vm15 = vcmp.eq.f32.partialorder %v1897_v52, inf  ;;  %v1909_v10 = vand.u32 2147483648, %v1897_v52  ;;  %vm1908_vm7 = vcmp.eq.f32.partialorder %v1897_v52, 0.0 }
 0xcc3   :  { %v2171_v53 = vpop.eup %2170 }
 0xcc4   :  { %v1900_v55 = vmul.f32 %v2171_v53, %v1897_v52 }
 0xcc6   :  { %v1901_v56 = vmul.f32 %v2171_v53, %v1900_v55 }
 0xcc8   :  { %v1902_v47 = vmul.f32 0.5, %v1901_v56 }
 0xcca   :  { %v1903_v58 = vsub.f32 1.5, %v1902_v47 }
 0xccc   :  { %v1904_v13 = vmul.f32 %v2171_v53, %v1903_v58 }
 0xcce   :  { %v1905_v35 = vmul.f32 %v1904_v13, %v1897_v52 }
 0xcd0   :  { %v1907_v59 = vsel %vm1906_vm15, %v1897_v52, %v1905_v35 }
 0xcd1   :  { %v1910_v61 = vsel %vm1908_vm7, %v1909_v10, %v1907_v59 }
 0xcd2   :  { %v1923_v32 = vadd.f32 1e-06, %v1910_v61 }
 0xcd4   :  { %2172 = vrcp.f32 %v1923_v32  ;;  %v1936_v3 = vand.u32 2147483648, %v1923_v32  ;;  %v1934_v4 = vand.u32 2147483647, %v1923_v32  ;;  %vm1930_vm3 = vweird.f32 %v1923_v32 }
 0xcd6   :  { %v1937_v8 = vor.u32 1.1754944e-38, %v1936_v3  ;;  %vm1935_vm5 = vcmp.eq.f32.partialorder %v1934_v4, 8.507059e+37 }
 0xcda   :  { %v2173_v63 = vpop.eup %2172 }
 0xcdb   :  { %v1926_v2 = vmul.f32 %v2173_v63, %v1923_v32  ;;  %vm1931_vm8 = vweird.f32 %v2173_v63 }
 0xcdc   :  { %vm1932_vm4 = vmor %vm1930_vm3, %vm1931_vm8 }
 0xcdd   :  { %v1927_v1 = vsub.f32 1.0, %v1926_v2 }
 0xcdf   :  { %v1928_v54 = vmul.f32 %v2173_v63, %v1927_v1 }
 0xce1   :  { %v1929_v7 = vadd.f32 %v2173_v63, %v1928_v54 }
 0xce3   :  { %v1933_v11 = vsel %vm1932_vm4, %v2173_v63, %v1929_v7 }
 0xce4   :  { %v1938_v5 = vsel %vm1935_vm5, %v1937_v8, %v1933_v11 }
 0xce5   :  { %v1953_v14 = vmul.f32 %v1938_v5, %v1887_v49 }
 0xce7   :  { %v1958_v36 = vmul.f32 %v2084_v12, %v1953_v14 }
 0xce9   :  { %v1963_v15 = vadd.f32 %v2085_v38, %v1958_v36 }
 0xceb   :  { %1965 = vst.msk [vmem:[#allocation13] sm:$0xff] %vm144_vm0, %v1963_v15 }
 0xd0a   :  { %v1896_v16 = vpop.xlane.xlu0 %1895 }
 0xd0b   :  { %v1898_v20 = vmul.f32 %v1896_v16, %v2501_v27 }
 0xd0d   :  { %2174 = vrsqrt.f32 %v1898_v20  ;;  %vm1918_vm6 = vcmp.eq.f32.partialorder %v1898_v20, inf  ;;  %v1921_v9 = vand.u32 2147483648, %v1898_v20  ;;  %vm1920_vm9 = vcmp.eq.f32.partialorder %v1898_v20, 0.0 }
 0xd13   :  { %v2175_v21 = vpop.eup %2174 }
 0xd14   :  { %v1912_v23 = vmul.f32 %v2175_v21, %v1898_v20 }
 0xd16   :  { %v1913_v22 = vmul.f32 %v2175_v21, %v1912_v23 }
 0xd18   :  { %v1914_v24 = vmul.f32 0.5, %v1913_v22 }
 0xd1a   :  { %v1915_v25 = vsub.f32 1.5, %v1914_v24 }
 0xd1c   :  { %v1916_v26 = vmul.f32 %v2175_v21, %v1915_v25 }
 0xd1e   :  { %v1917_v28 = vmul.f32 %v1916_v26, %v1898_v20 }
 0xd20   :  { %v1919_v30 = vsel %vm1918_vm6, %v1898_v20, %v1917_v28 }
 0xd21   :  { %v1922_v31 = vsel %vm1920_vm9, %v1921_v9, %v1919_v30 }
 0xd22   :  { %v1924_v33 = vadd.f32 1e-06, %v1922_v31 }
 0xd24   :  { %2176 = vrcp.f32 %v1924_v33  ;;  %v1950_v42 = vand.u32 2147483648, %v1924_v33  ;;  %v1948_v43 = vand.u32 2147483647, %v1924_v33  ;;  %vm1944_vm11 = vweird.f32 %v1924_v33 }
 0xd26   :  { %v1951_v62 = vor.u32 1.1754944e-38, %v1950_v42  ;;  %vm1949_vm13 = vcmp.eq.f32.partialorder %v1948_v43, 8.507059e+37 }
 0xd2a   :  { %v2177_v18 = vpop.eup %2176 }
 0xd2b   :  { %v1940_v44 = vmul.f32 %v2177_v18, %v1924_v33  ;;  %vm1945_vm10 = vweird.f32 %v2177_v18 }
 0xd2c   :  { %vm1946_vm12 = vmor %vm1944_vm11, %vm1945_vm10 }
 0xd2d   :  { %v1941_v40 = vsub.f32 1.0, %v1940_v44 }
 0xd2f   :  { %v1942_v27 = vmul.f32 %v2177_v18, %v1941_v40 }
 0xd31   :  { %v1943_v39 = vadd.f32 %v2177_v18, %v1942_v27 }
 0xd33   :  { %v1947_v6 = vsel %vm1946_vm12, %v2177_v18, %v1943_v39 }
 0xd34   :  { %v1952_v19 = vsel %vm1949_vm13, %v1951_v62, %v1947_v6 }
 0xd35   :  { %v1954_v45 = vmul.f32 %v1952_v19, %v2881_v17 }
 0xd37   :  { %v1959_v48 = vmul.f32 %v2084_v12, %v1954_v45 }
 0xd39   :  { %v1964_v46 = vadd.f32 %v2085_v38, %v1959_v48 }
 0xd3b   :  { %1966 = vst.msk [vmem:[#allocation13 + $0x8] sm:$0xff] %vm144_vm0, %v1964_v46 }
 0xd3c   :  { %1979 = dma.vmem_to_hbm [thread:$0]  %s1972_s11, 256, %s1974_s4, [#allocation4], %s2359_s29, %s2359_s29, %s2360_s30  }
 0xd3d   :  { %2356 = dma.done.wait [#allocation4], 256  }
 0xd3e   :  { %2357 = vsyncadd [#allocation4], 4294967040 }
 0xd3f   :  { %1984 = vsyncpa [#allocation3], 1 }
 0xd40   :  { %1985 = vsyncpa [#allocation6], 1 }
 0xd41   :  { %1986 = vsyncpa [#allocation9], 1 }
 0xd42   :  { %1987 = vsyncpa [#allocation12], 1 }
 0xd43   :  { %1988 = vsyncpa [#allocation4], 1 }

</bundles_post_ra>
